<compile_context>
chip_gen: v6e
topology: v6e:2x2x1
jax: 0.10.0
libtpu: 0.0.40
codegen_flags: <defaults>
</compile_context>

<pallas_src>
import jax
import jax.numpy as jnp
from jax.experimental import pallas as pl
from jax.experimental.pallas import tpu as pltpu

# ---- small synthetic "distilbert" config ----
B, S, H = 2, 8, 32          # batch, seq, hidden_size
NH = 2                      # attention heads
DH = H // NH                # head dim
FFN = 4 * H                 # intermediate size
VOCAB = 128
MAX_POS = 16
NUM_LABELS = 2
N_LAYERS = 2
EPS = 1e-12                 # DistilBERT LayerNorm eps
LOGITS_PAD = 128            # lane-dense logits slab width (sliced to NUM_LABELS outside)
NEG_BIG = -1e9              # additive mask bias (NaN-safe vs finfo.min fill)

LAYER_KEYS = ('wq_h', 'bq_h', 'wk_h', 'bk_h', 'wv_h', 'bv_h', 'wo_h', 'bo',
              'g_sa', 'b_sa', 'w1', 'b1', 'w2', 'b2', 'g_out', 'b_out')


def _layernorm(x, g, b):
    mu = jnp.mean(x, axis=-1, keepdims=True)
    var = jnp.mean((x - mu) ** 2, axis=-1, keepdims=True)
    return (x - mu) * jax.lax.rsqrt(var + EPS) * g + b


# ---------------- fused forward kernel: one grid step == one transformer layer ----------------
def fused_forward_kernel(
        emb_ref, maskb_ref, emb_g_ref, emb_b_ref,
        wq_ref, bq_ref, wk_ref, bk_ref, wv_ref, bv_ref, wo_ref, bo_ref,
        g_sa_ref, b_sa_ref, w1_ref, b1_ref, w2_ref, b2_ref,
        g_out_ref, b_out_ref,
        mlayer_ref, wpre_ref, bpre_ref, wcls_ref, bcls_ref,
        h_ref, logits_ref):
    l = pl.program_id(0)
    last = pl.num_programs(0) - 1

    # -- step 0: embedding LayerNorm seeds the resident hidden-state block --
    @pl.when(l == 0)
    def _():
        h_ref[...] = _layernorm(emb_ref[...], emb_g_ref[...], emb_b_ref[...])
        logits_ref[...] = jnp.zeros_like(logits_ref)

    h = h_ref[...]                                   # [B*S, H] f32 (resident carry)
    hb = h.astype(jnp.bfloat16)
    mask_b = maskb_ref[...][:, None, :]              # [B, 1, S], hoisted out of head loop
    scale = 1.0 / (DH ** 0.5)

    # ---- multi-head self-attention (per-head weights pre-split host-side) ----
    attn = jnp.zeros((B * S, H), jnp.float32)
    for hh in range(NH):                             # static unroll; no lane slicing/concat
        q = jnp.dot(hb, wq_ref[hh], preferred_element_type=jnp.float32) + bq_ref[hh]
        k = jnp.dot(hb, wk_ref[hh], preferred_element_type=jnp.float32) + bk_ref[hh]
        v = jnp.dot(hb, wv_ref[hh], preferred_element_type=jnp.float32) + bv_ref[hh]
        q3 = (q * scale).reshape(B, S, DH).astype(jnp.bfloat16)
        k3 = k.reshape(B, S, DH).astype(jnp.bfloat16)
        v3 = v.reshape(B, S, DH).astype(jnp.bfloat16)
        s = jnp.einsum('bqd,bkd->bqk', q3, k3,
                       preferred_element_type=jnp.float32) + mask_b
        m = jnp.max(s, axis=-1, keepdims=True)
        e = jnp.exp(s - m)
        p = e * pl.reciprocal(jnp.sum(e, axis=-1, keepdims=True), approx=True)
        ctx = jnp.einsum('bqk,bkd->bqd', p.astype(jnp.bfloat16), v3,
                         preferred_element_type=jnp.float32)
        # head concat fused into the output projection: sum_h ctx_h @ Wo[h]
        attn = attn + jnp.dot(ctx.reshape(B * S, DH).astype(jnp.bfloat16),
                              wo_ref[hh], preferred_element_type=jnp.float32)
    attn = attn + bo_ref[...]

    h_sa = _layernorm(attn + h, g_sa_ref[...], b_sa_ref[...])

    # ---- FFN ----
    ff = jnp.dot(h_sa.astype(jnp.bfloat16), w1_ref[...],
                 preferred_element_type=jnp.float32) + b1_ref[...]
    # TODO(synk): DistilBERT uses exact erf-based GELU; tanh approximation used here.
    ff = jax.nn.gelu(ff, approximate=True)
    ff = jnp.dot(ff.astype(jnp.bfloat16), w2_ref[...],
                 preferred_element_type=jnp.float32) + b2_ref[...]
    h_new = _layernorm(ff + h_sa, g_out_ref[...], b_out_ref[...])
    h_ref[...] = h_new

    # -- last step: CLS * masking_layer -> pre_classifier -> ReLU -> classifier --
    @pl.when(l == last)
    def _():
        cls = h_new.reshape(B, S, H)[:, 0, :]        # hidden_state[:, 0]  [B, H]
        pooled = cls * mlayer_ref[...]               # masking_layer (all ones)
        pre = jnp.dot(pooled, wpre_ref[...],
                      preferred_element_type=jnp.float32) + bpre_ref[...]
        pre = jnp.maximum(pre, 0.0)                  # ReLU
        logits_ref[...] = jnp.dot(pre, wcls_ref[...],
                                  preferred_element_type=jnp.float32) + bcls_ref[...]


# ---------------- BlockSpec helpers ----------------
def _const_spec(x):
    nd = x.ndim
    return pl.BlockSpec(x.shape, lambda l, _nd=nd: (0,) * _nd)


def _layer_spec(x):
    rest = tuple(x.shape[1:])
    nd = len(rest)
    return pl.BlockSpec((None,) + rest, lambda l, _nd=nd: (l,) + (0,) * _nd)


# ---------------- deterministic parameter init (kernel-ready layout) ----------------
def init_params(key):
    keys = iter(jax.random.split(key, 256))

    def w(shape, scale=0.02):
        return (scale * jax.random.normal(next(keys), shape)).astype(jnp.float32)

    def stack(shape, scale=0.02):
        return jnp.stack([w(shape, scale) for _ in range(N_LAYERS)], axis=0)

    # Linear weights stored pre-transposed as [in, out] (y = x @ W + b == PyTorch x @ W.T + b)
    wq = stack((H, H)); wk = stack((H, H)); wv = stack((H, H)); wo = stack((H, H))
    bq = stack((1, H)); bk = stack((1, H)); bv = stack((1, H)); bo = stack((1, H))
    w1 = stack((H, FFN)); b1 = stack((1, FFN))
    w2 = stack((FFN, H)); b2 = stack((1, H))

    def split_out_heads(wfull):          # [L,H,H] -> [L,NH,H,DH]  (split output columns)
        return wfull.reshape(N_LAYERS, H, NH, DH).transpose(0, 2, 1, 3)

    def split_out_heads_bias(bfull):     # [L,1,H] -> [L,NH,1,DH]
        return bfull.reshape(N_LAYERS, 1, NH, DH).transpose(0, 2, 1, 3)

    w_cls = w((H, NUM_LABELS))
    b_cls = w((1, NUM_LABELS))
    w_cls_pad = jnp.zeros((H, LOGITS_PAD), jnp.float32).at[:, :NUM_LABELS].set(w_cls)
    b_cls_pad = jnp.zeros((1, LOGITS_PAD), jnp.float32).at[:, :NUM_LABELS].set(b_cls)

    return {
        'word_emb': w((VOCAB, H)),
        'pos_emb': w((MAX_POS, H)),
        'emb_g': jnp.ones((1, H), jnp.float32),
        'emb_b': jnp.zeros((1, H), jnp.float32),
        # per-head-split, layer-stacked projection weights (bf16 for the MXU)
        'wq_h': split_out_heads(wq).astype(jnp.bfloat16), 'bq_h': split_out_heads_bias(bq),
        'wk_h': split_out_heads(wk).astype(jnp.bfloat16), 'bk_h': split_out_heads_bias(bk),
        'wv_h': split_out_heads(wv).astype(jnp.bfloat16), 'bv_h': split_out_heads_bias(bv),
        'wo_h': wo.reshape(N_LAYERS, NH, DH, H).astype(jnp.bfloat16),   # split input rows
        'bo': bo,
        'g_sa': jnp.ones((N_LAYERS, 1, H), jnp.float32),
        'b_sa': jnp.zeros((N_LAYERS, 1, H), jnp.float32),
        'w1': w1.astype(jnp.bfloat16), 'b1': b1,
        'w2': w2.astype(jnp.bfloat16), 'b2': b2,
        'g_out': jnp.ones((N_LAYERS, 1, H), jnp.float32),
        'b_out': jnp.zeros((N_LAYERS, 1, H), jnp.float32),
        # classification head
        'masking_layer': jnp.ones((1, H), jnp.float32),     # torch.ones(hidden_size)
        'w_pre': w((H, H)), 'b_pre': w((1, H)),
        'w_cls_pad': w_cls_pad, 'b_cls_pad': b_cls_pad,
    }


# ---------------- full forward (CustomModel.forward equivalent) ----------------
def forward(params, input_ids, attention_mask, labels=None):
    bsz, seq = input_ids.shape
    assert (bsz, seq) == (B, S)

    # embeddings (gather is plain-JAX glue)
    we = jnp.take(params['word_emb'], input_ids, axis=0)            # [B,S,H]
    pe = params['pos_emb'][:seq][None, :, :]                        # [1,S,H]
    emb2d = (we + pe).reshape(B * S, H).astype(jnp.float32)
    # additive attention-mask bias (NaN-safe even for fully-masked rows)
    mask_bias = (1.0 - attention_mask.astype(jnp.float32)) * NEG_BIG    # [B,S]

    args = (emb2d, mask_bias, params['emb_g'], params['emb_b'],
            *(params[k] for k in LAYER_KEYS),
            params['masking_layer'], params['w_pre'], params['b_pre'],
            params['w_cls_pad'], params['b_cls_pad'])

    in_specs = ([_const_spec(a) for a in args[:4]]
                + [_layer_spec(a) for a in args[4:4 + len(LAYER_KEYS)]]
                + [_const_spec(a) for a in args[4 + len(LAYER_KEYS):]])

    h_flat, logits_pad = pl.pallas_call(
        fused_forward_kernel,
        grid_spec=pltpu.PrefetchScalarGridSpec(
            num_scalar_prefetch=0,
            grid=(N_LAYERS,),
            in_specs=in_specs,
            out_specs=(
                pl.BlockSpec((B * S, H), lambda l: (0, 0)),         # resident hidden-state carry
                pl.BlockSpec((B, LOGITS_PAD), lambda l: (0, 0)),    # lane-dense logits slab
            )),
        out_shape=(jax.ShapeDtypeStruct((B * S, H), jnp.float32),
                   jax.ShapeDtypeStruct((B, LOGITS_PAD), jnp.float32)),
        compiler_params=pltpu.CompilerParams(
            dimension_semantics=("arbitrary",)),                    # layer axis carries state
    )(*args)

    logits = logits_pad[:, :NUM_LABELS]
    pooled_output1 = h_flat.reshape(B, S, H)[:, 0]                  # hidden_state[:, 0], [B,H]

    loss = None
    if labels is not None:
        # single_label_classification path (num_labels > 1, integer labels): CrossEntropyLoss
        logp = jax.nn.log_softmax(logits, axis=-1)
        loss = -jnp.mean(jnp.take_along_axis(logp, labels[:, None], axis=-1))
    # Mirrors `return (SequenceClassifierOutput(loss, logits, ...), pooled_output1)`
    return loss, logits, pooled_output1


if __name__ == "__main__":
    key = jax.random.PRNGKey(0)
    pkey, ikey = jax.random.split(key)
    params = init_params(pkey)

    input_ids = jax.random.randint(ikey, (B, S), 0, VOCAB, dtype=jnp.int32)
    attention_mask = jnp.ones((B, S), jnp.float32)
    labels = jnp.array([0, 1], dtype=jnp.int32)

    loss, logits, pooled = forward(params, input_ids, attention_mask, labels)
    jax.block_until_ready((loss, logits, pooled))
    assert logits.shape == (B, NUM_LABELS)
    assert pooled.shape == (B, H)
    print("KERNEL_OK")
</pallas_src>

<mosaic_0001>
module attributes {stable_mosaic.version = 11 : i64} {
  func.func @fused_forward_kernel(%arg0: i32, %arg1: memref<16x32xf32, #tpu.memory_space<vmem>>, %arg2: memref<2x8xf32, #tpu.memory_space<vmem>>, %arg3: memref<1x32xf32, #tpu.memory_space<vmem>>, %arg4: memref<1x32xf32, #tpu.memory_space<vmem>>, %arg5: memref<1x2x32x16xbf16, #tpu.memory_space<vmem>>, %arg6: memref<1x2x1x16xf32, #tpu.memory_space<vmem>>, %arg7: memref<1x2x32x16xbf16, #tpu.memory_space<vmem>>, %arg8: memref<1x2x1x16xf32, #tpu.memory_space<vmem>>, %arg9: memref<1x2x32x16xbf16, #tpu.memory_space<vmem>>, %arg10: memref<1x2x1x16xf32, #tpu.memory_space<vmem>>, %arg11: memref<1x2x16x32xbf16, #tpu.memory_space<vmem>>, %arg12: memref<1x1x32xf32, #tpu.memory_space<vmem>>, %arg13: memref<1x1x32xf32, #tpu.memory_space<vmem>>, %arg14: memref<1x1x32xf32, #tpu.memory_space<vmem>>, %arg15: memref<1x32x128xbf16, #tpu.memory_space<vmem>>, %arg16: memref<1x1x128xf32, #tpu.memory_space<vmem>>, %arg17: memref<1x128x32xbf16, #tpu.memory_space<vmem>>, %arg18: memref<1x1x32xf32, #tpu.memory_space<vmem>>, %arg19: memref<1x1x32xf32, #tpu.memory_space<vmem>>, %arg20: memref<1x1x32xf32, #tpu.memory_space<vmem>>, %arg21: memref<1x32xf32, #tpu.memory_space<vmem>>, %arg22: memref<32x32xf32, #tpu.memory_space<vmem>>, %arg23: memref<1x32xf32, #tpu.memory_space<vmem>>, %arg24: memref<32x128xf32, #tpu.memory_space<vmem>>, %arg25: memref<1x128xf32, #tpu.memory_space<vmem>>, %arg26: memref<16x32xf32, #tpu.memory_space<vmem>>, %arg27: memref<2x128xf32, #tpu.memory_space<vmem>>) attributes {dimension_semantics = [#tpu.dimension_semantics<arbitrary>], iteration_bounds = array<i64: 2>, scalar_prefetch = 0 : i64, scratch_operands = 0 : i64, tpu.core_type = #tpu.core_type<tc>, window_params = [{pipeline_mode = #tpu.pipeline_mode<synchronous>, transform_indices = @transform_0, window_bounds = array<i64: 16, 32>}, {pipeline_mode = #tpu.pipeline_mode<synchronous>, transform_indices = @transform_1, window_bounds = array<i64: 2, 8>}, {pipeline_mode = #tpu.pipeline_mode<synchronous>, transform_indices = @transform_2, window_bounds = array<i64: 1, 32>}, {pipeline_mode = #tpu.pipeline_mode<synchronous>, transform_indices = @transform_3, window_bounds = array<i64: 1, 32>}, {transform_indices = @transform_4, window_bounds = array<i64: 1, 2, 32, 16>}, {transform_indices = @transform_5, window_bounds = array<i64: 1, 2, 1, 16>}, {transform_indices = @transform_6, window_bounds = array<i64: 1, 2, 32, 16>}, {transform_indices = @transform_7, window_bounds = array<i64: 1, 2, 1, 16>}, {transform_indices = @transform_8, window_bounds = array<i64: 1, 2, 32, 16>}, {transform_indices = @transform_9, window_bounds = array<i64: 1, 2, 1, 16>}, {transform_indices = @transform_10, window_bounds = array<i64: 1, 2, 16, 32>}, {transform_indices = @transform_11, window_bounds = array<i64: 1, 1, 32>}, {transform_indices = @transform_12, window_bounds = array<i64: 1, 1, 32>}, {transform_indices = @transform_13, window_bounds = array<i64: 1, 1, 32>}, {transform_indices = @transform_14, window_bounds = array<i64: 1, 32, 128>}, {transform_indices = @transform_15, window_bounds = array<i64: 1, 1, 128>}, {transform_indices = @transform_16, window_bounds = array<i64: 1, 128, 32>}, {transform_indices = @transform_17, window_bounds = array<i64: 1, 1, 32>}, {transform_indices = @transform_18, window_bounds = array<i64: 1, 1, 32>}, {transform_indices = @transform_19, window_bounds = array<i64: 1, 1, 32>}, {pipeline_mode = #tpu.pipeline_mode<synchronous>, transform_indices = @transform_20, window_bounds = array<i64: 1, 32>}, {pipeline_mode = #tpu.pipeline_mode<synchronous>, transform_indices = @transform_21, window_bounds = array<i64: 32, 32>}, {pipeline_mode = #tpu.pipeline_mode<synchronous>, transform_indices = @transform_22, window_bounds = array<i64: 1, 32>}, {pipeline_mode = #tpu.pipeline_mode<synchronous>, transform_indices = @transform_23, window_bounds = array<i64: 32, 128>}, {pipeline_mode = #tpu.pipeline_mode<synchronous>, transform_indices = @transform_24, window_bounds = array<i64: 1, 128>}, {pipeline_mode = #tpu.pipeline_mode<synchronous>, transform_indices = @transform_25, window_bounds = array<i64: 16, 32>}, {pipeline_mode = #tpu.pipeline_mode<synchronous>, transform_indices = @transform_26, window_bounds = array<i64: 2, 128>}]} {
    %c0_i32 = arith.constant 0 : i32
    %0 = arith.cmpi eq, %arg0, %c0_i32 : i32
    %1 = arith.extui %0 : i1 to i32
    %c0_i32_0 = arith.constant 0 : i32
    %2 = arith.cmpi ne, %1, %c0_i32_0 : i32
    scf.if %2 {
      %c0_123 = arith.constant 0 : index
      %c0_124 = arith.constant 0 : index
      %199 = vector.load %arg1[%c0_123, %c0_124] : memref<16x32xf32, #tpu.memory_space<vmem>>, vector<16x32xf32>
      %c0_125 = arith.constant 0 : index
      %c0_126 = arith.constant 0 : index
      %200 = vector.load %arg3[%c0_125, %c0_126] : memref<1x32xf32, #tpu.memory_space<vmem>>, vector<1x32xf32>
      %c0_127 = arith.constant 0 : index
      %c0_128 = arith.constant 0 : index
      %201 = vector.load %arg4[%c0_127, %c0_128] : memref<1x32xf32, #tpu.memory_space<vmem>>, vector<1x32xf32>
      %cst_129 = arith.constant dense<0.000000e+00> : vector<16xf32>
      %202 = vector.multi_reduction <add>, %199, %cst_129 [1] : vector<16x32xf32> to vector<16xf32>
      %203 = vector.shape_cast %202 : vector<16xf32> to vector<16x1xf32>
      %cst_130 = arith.constant 3.200000e+01 : f32
      %204 = vector.broadcast %cst_130 : f32 to vector<16x1xf32>
      %205 = arith.divf %203, %204 : vector<16x1xf32>
      %206 = vector.broadcast %205 : vector<16x1xf32> to vector<16x32xf32>
      %207 = arith.subf %199, %206 : vector<16x32xf32>
      %208 = arith.mulf %207, %207 : vector<16x32xf32>
      %cst_131 = arith.constant dense<0.000000e+00> : vector<16xf32>
      %209 = vector.multi_reduction <add>, %208, %cst_131 [1] : vector<16x32xf32> to vector<16xf32>
      %210 = vector.shape_cast %209 : vector<16xf32> to vector<16x1xf32>
      %cst_132 = arith.constant 3.200000e+01 : f32
      %211 = vector.broadcast %cst_132 : f32 to vector<16x1xf32>
      %212 = arith.divf %210, %211 : vector<16x1xf32>
      %213 = vector.broadcast %205 : vector<16x1xf32> to vector<16x32xf32>
      %214 = arith.subf %199, %213 : vector<16x32xf32>
      %cst_133 = arith.constant 9.99999996E-13 : f32
      %215 = vector.broadcast %cst_133 : f32 to vector<16x1xf32>
      %216 = arith.addf %212, %215 : vector<16x1xf32>
      %217 = math.rsqrt %216 : vector<16x1xf32>
      %218 = vector.broadcast %217 : vector<16x1xf32> to vector<16x32xf32>
      %219 = arith.mulf %214, %218 : vector<16x32xf32>
      %220 = vector.broadcast %200 : vector<1x32xf32> to vector<16x32xf32>
      %221 = arith.mulf %219, %220 : vector<16x32xf32>
      %222 = vector.broadcast %201 : vector<1x32xf32> to vector<16x32xf32>
      %223 = arith.addf %221, %222 : vector<16x32xf32>
      %c0_134 = arith.constant 0 : index
      %c0_135 = arith.constant 0 : index
      %224 = vector.load %arg26[%c0_134, %c0_135] : memref<16x32xf32, #tpu.memory_space<vmem>>, vector<16x32xf32>
      tpu.vector_store %arg26[%c0_134, %c0_135], %223 {strides = array<i32>} : memref<16x32xf32, #tpu.memory_space<vmem>>, vector<16x32xf32>,
      %cst_136 = arith.constant 0.000000e+00 : f32
      %225 = vector.broadcast %cst_136 : f32 to vector<2x128xf32>
      %c0_137 = arith.constant 0 : index
      %c0_138 = arith.constant 0 : index
      %226 = vector.load %arg27[%c0_137, %c0_138] : memref<2x128xf32, #tpu.memory_space<vmem>>, vector<2x128xf32>
      tpu.vector_store %arg27[%c0_137, %c0_138], %225 {strides = array<i32>} : memref<2x128xf32, #tpu.memory_space<vmem>>, vector<2x128xf32>,
    } else {
    }
    %c0 = arith.constant 0 : index
    %c0_1 = arith.constant 0 : index
    %3 = vector.load %arg26[%c0, %c0_1] : memref<16x32xf32, #tpu.memory_space<vmem>>, vector<16x32xf32>
    %4 = arith.truncf %3 : vector<16x32xf32> to vector<16x32xbf16>
    %c0_2 = arith.constant 0 : index
    %c0_3 = arith.constant 0 : index
    %5 = vector.load %arg2[%c0_2, %c0_3] : memref<2x8xf32, #tpu.memory_space<vmem>>, vector<2x8xf32>
    %6 = vector.shape_cast %5 : vector<2x8xf32> to vector<2x1x8xf32>
    %cst = arith.constant 0.000000e+00 : f32
    %7 = vector.broadcast %cst : f32 to vector<16x32xf32>
    %c0_4 = arith.constant 0 : index
    %c0_5 = arith.constant 0 : index
    %c0_6 = arith.constant 0 : index
    %c0_7 = arith.constant 0 : index
    %8 = vector.load %arg5[%c0_4, %c0_5, %c0_6, %c0_7] : memref<1x2x32x16xbf16, #tpu.memory_space<vmem>>, vector<1x1x32x16xbf16>
    %9 = vector.shape_cast %8 : vector<1x1x32x16xbf16> to vector<32x16xbf16>
    %cst_8 = arith.constant dense<0.000000e+00> : vector<16x16xf32>
    %10 = tpu.matmul %4, %9, %cst_8 {dimension_numbers = #tpu.dot_dimension_numbers<[1], [0], [0], [1], [0, 0, 1, 1], [], []>} : vector<16x32xbf16>, vector<32x16xbf16>, vector<16x16xf32> -> vector<16x16xf32>
    %c0_9 = arith.constant 0 : index
    %c0_10 = arith.constant 0 : index
    %c0_11 = arith.constant 0 : index
    %c0_12 = arith.constant 0 : index
    %11 = vector.load %arg6[%c0_9, %c0_10, %c0_11, %c0_12] : memref<1x2x1x16xf32, #tpu.memory_space<vmem>>, vector<1x1x1x16xf32>
    %12 = vector.shape_cast %11 : vector<1x1x1x16xf32> to vector<1x16xf32>
    %13 = vector.broadcast %12 : vector<1x16xf32> to vector<16x16xf32>
    %14 = arith.addf %10, %13 : vector<16x16xf32>
    %c0_13 = arith.constant 0 : index
    %c0_14 = arith.constant 0 : index
    %c0_15 = arith.constant 0 : index
    %c0_16 = arith.constant 0 : index
    %15 = vector.load %arg7[%c0_13, %c0_14, %c0_15, %c0_16] : memref<1x2x32x16xbf16, #tpu.memory_space<vmem>>, vector<1x1x32x16xbf16>
    %16 = vector.shape_cast %15 : vector<1x1x32x16xbf16> to vector<32x16xbf16>
    %cst_17 = arith.constant dense<0.000000e+00> : vector<16x16xf32>
    %17 = tpu.matmul %4, %16, %cst_17 {dimension_numbers = #tpu.dot_dimension_numbers<[1], [0], [0], [1], [0, 0, 1, 1], [], []>} : vector<16x32xbf16>, vector<32x16xbf16>, vector<16x16xf32> -> vector<16x16xf32>
    %c0_18 = arith.constant 0 : index
    %c0_19 = arith.constant 0 : index
    %c0_20 = arith.constant 0 : index
    %c0_21 = arith.constant 0 : index
    %18 = vector.load %arg8[%c0_18, %c0_19, %c0_20, %c0_21] : memref<1x2x1x16xf32, #tpu.memory_space<vmem>>, vector<1x1x1x16xf32>
    %19 = vector.shape_cast %18 : vector<1x1x1x16xf32> to vector<1x16xf32>
    %20 = vector.broadcast %19 : vector<1x16xf32> to vector<16x16xf32>
    %21 = arith.addf %17, %20 : vector<16x16xf32>
    %c0_22 = arith.constant 0 : index
    %c0_23 = arith.constant 0 : index
    %c0_24 = arith.constant 0 : index
    %c0_25 = arith.constant 0 : index
    %22 = vector.load %arg9[%c0_22, %c0_23, %c0_24, %c0_25] : memref<1x2x32x16xbf16, #tpu.memory_space<vmem>>, vector<1x1x32x16xbf16>
    %23 = vector.shape_cast %22 : vector<1x1x32x16xbf16> to vector<32x16xbf16>
    %cst_26 = arith.constant dense<0.000000e+00> : vector<16x16xf32>
    %24 = tpu.matmul %4, %23, %cst_26 {dimension_numbers = #tpu.dot_dimension_numbers<[1], [0], [0], [1], [0, 0, 1, 1], [], []>} : vector<16x32xbf16>, vector<32x16xbf16>, vector<16x16xf32> -> vector<16x16xf32>
    %c0_27 = arith.constant 0 : index
    %c0_28 = arith.constant 0 : index
    %c0_29 = arith.constant 0 : index
    %c0_30 = arith.constant 0 : index
    %25 = vector.load %arg10[%c0_27, %c0_28, %c0_29, %c0_30] : memref<1x2x1x16xf32, #tpu.memory_space<vmem>>, vector<1x1x1x16xf32>
    %26 = vector.shape_cast %25 : vector<1x1x1x16xf32> to vector<1x16xf32>
    %27 = vector.broadcast %26 : vector<1x16xf32> to vector<16x16xf32>
    %28 = arith.addf %24, %27 : vector<16x16xf32>
    %cst_31 = arith.constant 2.500000e-01 : f32
    %29 = vector.broadcast %cst_31 : f32 to vector<16x16xf32>
    %30 = arith.mulf %14, %29 : vector<16x16xf32>
    %31 = vector.shape_cast %30 : vector<16x16xf32> to vector<2x8x16xf32>
    %32 = arith.truncf %31 : vector<2x8x16xf32> to vector<2x8x16xbf16>
    %33 = vector.shape_cast %21 : vector<16x16xf32> to vector<2x8x16xf32>
    %34 = arith.truncf %33 : vector<2x8x16xf32> to vector<2x8x16xbf16>
    %35 = vector.shape_cast %28 : vector<16x16xf32> to vector<2x8x16xf32>
    %36 = arith.truncf %35 : vector<2x8x16xf32> to vector<2x8x16xbf16>
    "tpu.trace_start"() <{level = 10 : i32, message = "bqd,bkd->bqk"}> : () -> ()
    %cst_32 = arith.constant dense<0.000000e+00> : vector<2x8x8xf32>
    %37 = tpu.matmul %32, %34, %cst_32 {dimension_numbers = #tpu.dot_dimension_numbers<[2], [2], [1], [1], [0, 0, 0, 1, 1, 1], [0], [0]>} : vector<2x8x16xbf16>, vector<2x8x16xbf16>, vector<2x8x8xf32> -> vector<2x8x8xf32>
    "tpu.trace_stop"() : () -> ()
    %38 = vector.broadcast %6 : vector<2x1x8xf32> to vector<2x8x8xf32>
    %39 = arith.addf %37, %38 : vector<2x8x8xf32>
    %cst_33 = arith.constant dense<0xFF800000> : vector<2x8xf32>
    %40 = vector.multi_reduction <maximumf>, %39, %cst_33 [2] : vector<2x8x8xf32> to vector<2x8xf32>
    %41 = vector.shape_cast %40 : vector<2x8xf32> to vector<2x8x1xf32>
    %42 = vector.broadcast %41 : vector<2x8x1xf32> to vector<2x8x8xf32>
    %43 = arith.subf %39, %42 : vector<2x8x8xf32>
    %44 = math.exp %43 : vector<2x8x8xf32>
    %cst_34 = arith.constant dense<0.000000e+00> : vector<2x8xf32>
    %45 = vector.multi_reduction <add>, %44, %cst_34 [2] : vector<2x8x8xf32> to vector<2x8xf32>
    %46 = vector.shape_cast %45 : vector<2x8xf32> to vector<2x8x1xf32>
    %47 = tpu.reciprocal %46 {approx = true} : vector<2x8x1xf32> -> vector<2x8x1xf32>
    %48 = vector.broadcast %47 : vector<2x8x1xf32> to vector<2x8x8xf32>
    %49 = arith.mulf %44, %48 : vector<2x8x8xf32>
    %50 = arith.truncf %49 : vector<2x8x8xf32> to vector<2x8x8xbf16>
    "tpu.trace_start"() <{level = 10 : i32, message = "bqk,bkd->bqd"}> : () -> ()
    %cst_35 = arith.constant dense<0.000000e+00> : vector<2x8x16xf32>
    %51 = tpu.matmul %50, %36, %cst_35 {dimension_numbers = #tpu.dot_dimension_numbers<[2], [1], [1], [2], [0, 0, 0, 1, 1, 2], [0], [0]>} : vector<2x8x8xbf16>, vector<2x8x16xbf16>, vector<2x8x16xf32> -> vector<2x8x16xf32>
    "tpu.trace_stop"() : () -> ()
    %52 = vector.shape_cast %51 : vector<2x8x16xf32> to vector<16x16xf32>
    %53 = arith.truncf %52 : vector<16x16xf32> to vector<16x16xbf16>
    %c0_36 = arith.constant 0 : index
    %c0_37 = arith.constant 0 : index
    %c0_38 = arith.constant 0 : index
    %c0_39 = arith.constant 0 : index
    %54 = vector.load %arg11[%c0_36, %c0_37, %c0_38, %c0_39] : memref<1x2x16x32xbf16, #tpu.memory_space<vmem>>, vector<1x1x16x32xbf16>
    %55 = vector.shape_cast %54 : vector<1x1x16x32xbf16> to vector<16x32xbf16>
    %cst_40 = arith.constant dense<0.000000e+00> : vector<16x32xf32>
    %56 = tpu.matmul %53, %55, %cst_40 {dimension_numbers = #tpu.dot_dimension_numbers<[1], [0], [0], [1], [0, 0, 1, 1], [], []>} : vector<16x16xbf16>, vector<16x32xbf16>, vector<16x32xf32> -> vector<16x32xf32>
    %57 = arith.addf %7, %56 : vector<16x32xf32>
    %c0_41 = arith.constant 0 : index
    %c1 = arith.constant 1 : index
    %c0_42 = arith.constant 0 : index
    %c0_43 = arith.constant 0 : index
    %58 = vector.load %arg5[%c0_41, %c1, %c0_42, %c0_43] : memref<1x2x32x16xbf16, #tpu.memory_space<vmem>>, vector<1x1x32x16xbf16>
    %59 = vector.shape_cast %58 : vector<1x1x32x16xbf16> to vector<32x16xbf16>
    %cst_44 = arith.constant dense<0.000000e+00> : vector<16x16xf32>
    %60 = tpu.matmul %4, %59, %cst_44 {dimension_numbers = #tpu.dot_dimension_numbers<[1], [0], [0], [1], [0, 0, 1, 1], [], []>} : vector<16x32xbf16>, vector<32x16xbf16>, vector<16x16xf32> -> vector<16x16xf32>
    %c0_45 = arith.constant 0 : index
    %c1_46 = arith.constant 1 : index
    %c0_47 = arith.constant 0 : index
    %c0_48 = arith.constant 0 : index
    %61 = vector.load %arg6[%c0_45, %c1_46, %c0_47, %c0_48] : memref<1x2x1x16xf32, #tpu.memory_space<vmem>>, vector<1x1x1x16xf32>
    %62 = vector.shape_cast %61 : vector<1x1x1x16xf32> to vector<1x16xf32>
    %63 = vector.broadcast %62 : vector<1x16xf32> to vector<16x16xf32>
    %64 = arith.addf %60, %63 : vector<16x16xf32>
    %c0_49 = arith.constant 0 : index
    %c1_50 = arith.constant 1 : index
    %c0_51 = arith.constant 0 : index
    %c0_52 = arith.constant 0 : index
    %65 = vector.load %arg7[%c0_49, %c1_50, %c0_51, %c0_52] : memref<1x2x32x16xbf16, #tpu.memory_space<vmem>>, vector<1x1x32x16xbf16>
    %66 = vector.shape_cast %65 : vector<1x1x32x16xbf16> to vector<32x16xbf16>
    %cst_53 = arith.constant dense<0.000000e+00> : vector<16x16xf32>
    %67 = tpu.matmul %4, %66, %cst_53 {dimension_numbers = #tpu.dot_dimension_numbers<[1], [0], [0], [1], [0, 0, 1, 1], [], []>} : vector<16x32xbf16>, vector<32x16xbf16>, vector<16x16xf32> -> vector<16x16xf32>
    %c0_54 = arith.constant 0 : index
    %c1_55 = arith.constant 1 : index
    %c0_56 = arith.constant 0 : index
    %c0_57 = arith.constant 0 : index
    %68 = vector.load %arg8[%c0_54, %c1_55, %c0_56, %c0_57] : memref<1x2x1x16xf32, #tpu.memory_space<vmem>>, vector<1x1x1x16xf32>
    %69 = vector.shape_cast %68 : vector<1x1x1x16xf32> to vector<1x16xf32>
    %70 = vector.broadcast %69 : vector<1x16xf32> to vector<16x16xf32>
    %71 = arith.addf %67, %70 : vector<16x16xf32>
    %c0_58 = arith.constant 0 : index
    %c1_59 = arith.constant 1 : index
    %c0_60 = arith.constant 0 : index
    %c0_61 = arith.constant 0 : index
    %72 = vector.load %arg9[%c0_58, %c1_59, %c0_60, %c0_61] : memref<1x2x32x16xbf16, #tpu.memory_space<vmem>>, vector<1x1x32x16xbf16>
    %73 = vector.shape_cast %72 : vector<1x1x32x16xbf16> to vector<32x16xbf16>
    %cst_62 = arith.constant dense<0.000000e+00> : vector<16x16xf32>
    %74 = tpu.matmul %4, %73, %cst_62 {dimension_numbers = #tpu.dot_dimension_numbers<[1], [0], [0], [1], [0, 0, 1, 1], [], []>} : vector<16x32xbf16>, vector<32x16xbf16>, vector<16x16xf32> -> vector<16x16xf32>
    %c0_63 = arith.constant 0 : index
    %c1_64 = arith.constant 1 : index
    %c0_65 = arith.constant 0 : index
    %c0_66 = arith.constant 0 : index
    %75 = vector.load %arg10[%c0_63, %c1_64, %c0_65, %c0_66] : memref<1x2x1x16xf32, #tpu.memory_space<vmem>>, vector<1x1x1x16xf32>
    %76 = vector.shape_cast %75 : vector<1x1x1x16xf32> to vector<1x16xf32>
    %77 = vector.broadcast %76 : vector<1x16xf32> to vector<16x16xf32>
    %78 = arith.addf %74, %77 : vector<16x16xf32>
    %cst_67 = arith.constant 2.500000e-01 : f32
    %79 = vector.broadcast %cst_67 : f32 to vector<16x16xf32>
    %80 = arith.mulf %64, %79 : vector<16x16xf32>
    %81 = vector.shape_cast %80 : vector<16x16xf32> to vector<2x8x16xf32>
    %82 = arith.truncf %81 : vector<2x8x16xf32> to vector<2x8x16xbf16>
    %83 = vector.shape_cast %71 : vector<16x16xf32> to vector<2x8x16xf32>
    %84 = arith.truncf %83 : vector<2x8x16xf32> to vector<2x8x16xbf16>
    %85 = vector.shape_cast %78 : vector<16x16xf32> to vector<2x8x16xf32>
    %86 = arith.truncf %85 : vector<2x8x16xf32> to vector<2x8x16xbf16>
    "tpu.trace_start"() <{level = 10 : i32, message = "bqd,bkd->bqk"}> : () -> ()
    %cst_68 = arith.constant dense<0.000000e+00> : vector<2x8x8xf32>
    %87 = tpu.matmul %82, %84, %cst_68 {dimension_numbers = #tpu.dot_dimension_numbers<[2], [2], [1], [1], [0, 0, 0, 1, 1, 1], [0], [0]>} : vector<2x8x16xbf16>, vector<2x8x16xbf16>, vector<2x8x8xf32> -> vector<2x8x8xf32>
    "tpu.trace_stop"() : () -> ()
    %88 = vector.broadcast %6 : vector<2x1x8xf32> to vector<2x8x8xf32>
    %89 = arith.addf %87, %88 : vector<2x8x8xf32>
    %cst_69 = arith.constant dense<0xFF800000> : vector<2x8xf32>
    %90 = vector.multi_reduction <maximumf>, %89, %cst_69 [2] : vector<2x8x8xf32> to vector<2x8xf32>
    %91 = vector.shape_cast %90 : vector<2x8xf32> to vector<2x8x1xf32>
    %92 = vector.broadcast %91 : vector<2x8x1xf32> to vector<2x8x8xf32>
    %93 = arith.subf %89, %92 : vector<2x8x8xf32>
    %94 = math.exp %93 : vector<2x8x8xf32>
    %cst_70 = arith.constant dense<0.000000e+00> : vector<2x8xf32>
    %95 = vector.multi_reduction <add>, %94, %cst_70 [2] : vector<2x8x8xf32> to vector<2x8xf32>
    %96 = vector.shape_cast %95 : vector<2x8xf32> to vector<2x8x1xf32>
    %97 = tpu.reciprocal %96 {approx = true} : vector<2x8x1xf32> -> vector<2x8x1xf32>
    %98 = vector.broadcast %97 : vector<2x8x1xf32> to vector<2x8x8xf32>
    %99 = arith.mulf %94, %98 : vector<2x8x8xf32>
    %100 = arith.truncf %99 : vector<2x8x8xf32> to vector<2x8x8xbf16>
    "tpu.trace_start"() <{level = 10 : i32, message = "bqk,bkd->bqd"}> : () -> ()
    %cst_71 = arith.constant dense<0.000000e+00> : vector<2x8x16xf32>
    %101 = tpu.matmul %100, %86, %cst_71 {dimension_numbers = #tpu.dot_dimension_numbers<[2], [1], [1], [2], [0, 0, 0, 1, 1, 2], [0], [0]>} : vector<2x8x8xbf16>, vector<2x8x16xbf16>, vector<2x8x16xf32> -> vector<2x8x16xf32>
    "tpu.trace_stop"() : () -> ()
    %102 = vector.shape_cast %101 : vector<2x8x16xf32> to vector<16x16xf32>
    %103 = arith.truncf %102 : vector<16x16xf32> to vector<16x16xbf16>
    %c0_72 = arith.constant 0 : index
    %c1_73 = arith.constant 1 : index
    %c0_74 = arith.constant 0 : index
    %c0_75 = arith.constant 0 : index
    %104 = vector.load %arg11[%c0_72, %c1_73, %c0_74, %c0_75] : memref<1x2x16x32xbf16, #tpu.memory_space<vmem>>, vector<1x1x16x32xbf16>
    %105 = vector.shape_cast %104 : vector<1x1x16x32xbf16> to vector<16x32xbf16>
    %cst_76 = arith.constant dense<0.000000e+00> : vector<16x32xf32>
    %106 = tpu.matmul %103, %105, %cst_76 {dimension_numbers = #tpu.dot_dimension_numbers<[1], [0], [0], [1], [0, 0, 1, 1], [], []>} : vector<16x16xbf16>, vector<16x32xbf16>, vector<16x32xf32> -> vector<16x32xf32>
    %107 = arith.addf %57, %106 : vector<16x32xf32>
    %c0_77 = arith.constant 0 : index
    %c0_78 = arith.constant 0 : index
    %c0_79 = arith.constant 0 : index
    %108 = vector.load %arg12[%c0_77, %c0_78, %c0_79] : memref<1x1x32xf32, #tpu.memory_space<vmem>>, vector<1x1x32xf32>
    %109 = vector.shape_cast %108 : vector<1x1x32xf32> to vector<1x32xf32>
    %110 = vector.broadcast %109 : vector<1x32xf32> to vector<16x32xf32>
    %111 = arith.addf %107, %110 : vector<16x32xf32>
    %112 = arith.addf %111, %3 : vector<16x32xf32>
    %c0_80 = arith.constant 0 : index
    %c0_81 = arith.constant 0 : index
    %c0_82 = arith.constant 0 : index
    %113 = vector.load %arg13[%c0_80, %c0_81, %c0_82] : memref<1x1x32xf32, #tpu.memory_space<vmem>>, vector<1x1x32xf32>
    %114 = vector.shape_cast %113 : vector<1x1x32xf32> to vector<1x32xf32>
    %c0_83 = arith.constant 0 : index
    %c0_84 = arith.constant 0 : index
    %c0_85 = arith.constant 0 : index
    %115 = vector.load %arg14[%c0_83, %c0_84, %c0_85] : memref<1x1x32xf32, #tpu.memory_space<vmem>>, vector<1x1x32xf32>
    %116 = vector.shape_cast %115 : vector<1x1x32xf32> to vector<1x32xf32>
    %cst_86 = arith.constant dense<0.000000e+00> : vector<16xf32>
    %117 = vector.multi_reduction <add>, %112, %cst_86 [1] : vector<16x32xf32> to vector<16xf32>
    %118 = vector.shape_cast %117 : vector<16xf32> to vector<16x1xf32>
    %cst_87 = arith.constant 3.200000e+01 : f32
    %119 = vector.broadcast %cst_87 : f32 to vector<16x1xf32>
    %120 = arith.divf %118, %119 : vector<16x1xf32>
    %121 = vector.broadcast %120 : vector<16x1xf32> to vector<16x32xf32>
    %122 = arith.subf %112, %121 : vector<16x32xf32>
    %123 = arith.mulf %122, %122 : vector<16x32xf32>
    %cst_88 = arith.constant dense<0.000000e+00> : vector<16xf32>
    %124 = vector.multi_reduction <add>, %123, %cst_88 [1] : vector<16x32xf32> to vector<16xf32>
    %125 = vector.shape_cast %124 : vector<16xf32> to vector<16x1xf32>
    %cst_89 = arith.constant 3.200000e+01 : f32
    %126 = vector.broadcast %cst_89 : f32 to vector<16x1xf32>
    %127 = arith.divf %125, %126 : vector<16x1xf32>
    %128 = vector.broadcast %120 : vector<16x1xf32> to vector<16x32xf32>
    %129 = arith.subf %112, %128 : vector<16x32xf32>
    %cst_90 = arith.constant 9.99999996E-13 : f32
    %130 = vector.broadcast %cst_90 : f32 to vector<16x1xf32>
    %131 = arith.addf %127, %130 : vector<16x1xf32>
    %132 = math.rsqrt %131 : vector<16x1xf32>
    %133 = vector.broadcast %132 : vector<16x1xf32> to vector<16x32xf32>
    %134 = arith.mulf %129, %133 : vector<16x32xf32>
    %135 = vector.broadcast %114 : vector<1x32xf32> to vector<16x32xf32>
    %136 = arith.mulf %134, %135 : vector<16x32xf32>
    %137 = vector.broadcast %116 : vector<1x32xf32> to vector<16x32xf32>
    %138 = arith.addf %136, %137 : vector<16x32xf32>
    %139 = arith.truncf %138 : vector<16x32xf32> to vector<16x32xbf16>
    %c0_91 = arith.constant 0 : index
    %c0_92 = arith.constant 0 : index
    %c0_93 = arith.constant 0 : index
    %140 = vector.load %arg15[%c0_91, %c0_92, %c0_93] : memref<1x32x128xbf16, #tpu.memory_space<vmem>>, vector<1x32x128xbf16>
    %141 = vector.shape_cast %140 : vector<1x32x128xbf16> to vector<32x128xbf16>
    %cst_94 = arith.constant dense<0.000000e+00> : vector<16x128xf32>
    %142 = tpu.matmul %139, %141, %cst_94 {dimension_numbers = #tpu.dot_dimension_numbers<[1], [0], [0], [1], [0, 0, 1, 1], [], []>} : vector<16x32xbf16>, vector<32x128xbf16>, vector<16x128xf32> -> vector<16x128xf32>
    %c0_95 = arith.constant 0 : index
    %c0_96 = arith.constant 0 : index
    %c0_97 = arith.constant 0 : index
    %143 = vector.load %arg16[%c0_95, %c0_96, %c0_97] : memref<1x1x128xf32, #tpu.memory_space<vmem>>, vector<1x1x128xf32>
    %144 = vector.shape_cast %143 : vector<1x1x128xf32> to vector<1x128xf32>
    %145 = vector.broadcast %144 : vector<1x128xf32> to vector<16x128xf32>
    %146 = arith.addf %142, %145 : vector<16x128xf32>
    %147 = arith.mulf %146, %146 : vector<16x128xf32>
    %148 = arith.mulf %146, %147 : vector<16x128xf32>
    %cst_98 = arith.constant 4.471500e-02 : f32
    %149 = vector.broadcast %cst_98 : f32 to vector<16x128xf32>
    %150 = arith.mulf %149, %148 : vector<16x128xf32>
    %151 = arith.addf %146, %150 : vector<16x128xf32>
    %cst_99 = arith.constant 0.797884583 : f32
    %152 = vector.broadcast %cst_99 : f32 to vector<16x128xf32>
    %153 = arith.mulf %152, %151 : vector<16x128xf32>
    %154 = math.tanh %153 : vector<16x128xf32>
    %cst_100 = arith.constant 1.000000e+00 : f32
    %155 = vector.broadcast %cst_100 : f32 to vector<16x128xf32>
    %156 = arith.addf %155, %154 : vector<16x128xf32>
    %cst_101 = arith.constant 5.000000e-01 : f32
    %157 = vector.broadcast %cst_101 : f32 to vector<16x128xf32>
    %158 = arith.mulf %157, %156 : vector<16x128xf32>
    %159 = arith.mulf %146, %158 : vector<16x128xf32>
    %160 = arith.truncf %159 : vector<16x128xf32> to vector<16x128xbf16>
    %c0_102 = arith.constant 0 : index
    %c0_103 = arith.constant 0 : index
    %c0_104 = arith.constant 0 : index
    %161 = vector.load %arg17[%c0_102, %c0_103, %c0_104] : memref<1x128x32xbf16, #tpu.memory_space<vmem>>, vector<1x128x32xbf16>
    %162 = vector.shape_cast %161 : vector<1x128x32xbf16> to vector<128x32xbf16>
    %cst_105 = arith.constant dense<0.000000e+00> : vector<16x32xf32>
    %163 = tpu.matmul %160, %162, %cst_105 {dimension_numbers = #tpu.dot_dimension_numbers<[1], [0], [0], [1], [0, 0, 1, 1], [], []>} : vector<16x128xbf16>, vector<128x32xbf16>, vector<16x32xf32> -> vector<16x32xf32>
    %c0_106 = arith.constant 0 : index
    %c0_107 = arith.constant 0 : index
    %c0_108 = arith.constant 0 : index
    %164 = vector.load %arg18[%c0_106, %c0_107, %c0_108] : memref<1x1x32xf32, #tpu.memory_space<vmem>>, vector<1x1x32xf32>
    %165 = vector.shape_cast %164 : vector<1x1x32xf32> to vector<1x32xf32>
    %166 = vector.broadcast %165 : vector<1x32xf32> to vector<16x32xf32>
    %167 = arith.addf %163, %166 : vector<16x32xf32>
    %168 = arith.addf %167, %138 : vector<16x32xf32>
    %c0_109 = arith.constant 0 : index
    %c0_110 = arith.constant 0 : index
    %c0_111 = arith.constant 0 : index
    %169 = vector.load %arg19[%c0_109, %c0_110, %c0_111] : memref<1x1x32xf32, #tpu.memory_space<vmem>>, vector<1x1x32xf32>
    %170 = vector.shape_cast %169 : vector<1x1x32xf32> to vector<1x32xf32>
    %c0_112 = arith.constant 0 : index
    %c0_113 = arith.constant 0 : index
    %c0_114 = arith.constant 0 : index
    %171 = vector.load %arg20[%c0_112, %c0_113, %c0_114] : memref<1x1x32xf32, #tpu.memory_space<vmem>>, vector<1x1x32xf32>
    %172 = vector.shape_cast %171 : vector<1x1x32xf32> to vector<1x32xf32>
    %cst_115 = arith.constant dense<0.000000e+00> : vector<16xf32>
    %173 = vector.multi_reduction <add>, %168, %cst_115 [1] : vector<16x32xf32> to vector<16xf32>
    %174 = vector.shape_cast %173 : vector<16xf32> to vector<16x1xf32>
    %cst_116 = arith.constant 3.200000e+01 : f32
    %175 = vector.broadcast %cst_116 : f32 to vector<16x1xf32>
    %176 = arith.divf %174, %175 : vector<16x1xf32>
    %177 = vector.broadcast %176 : vector<16x1xf32> to vector<16x32xf32>
    %178 = arith.subf %168, %177 : vector<16x32xf32>
    %179 = arith.mulf %178, %178 : vector<16x32xf32>
    %cst_117 = arith.constant dense<0.000000e+00> : vector<16xf32>
    %180 = vector.multi_reduction <add>, %179, %cst_117 [1] : vector<16x32xf32> to vector<16xf32>
    %181 = vector.shape_cast %180 : vector<16xf32> to vector<16x1xf32>
    %cst_118 = arith.constant 3.200000e+01 : f32
    %182 = vector.broadcast %cst_118 : f32 to vector<16x1xf32>
    %183 = arith.divf %181, %182 : vector<16x1xf32>
    %184 = vector.broadcast %176 : vector<16x1xf32> to vector<16x32xf32>
    %185 = arith.subf %168, %184 : vector<16x32xf32>
    %cst_119 = arith.constant 9.99999996E-13 : f32
    %186 = vector.broadcast %cst_119 : f32 to vector<16x1xf32>
    %187 = arith.addf %183, %186 : vector<16x1xf32>
    %188 = math.rsqrt %187 : vector<16x1xf32>
    %189 = vector.broadcast %188 : vector<16x1xf32> to vector<16x32xf32>
    %190 = arith.mulf %185, %189 : vector<16x32xf32>
    %191 = vector.broadcast %170 : vector<1x32xf32> to vector<16x32xf32>
    %192 = arith.mulf %190, %191 : vector<16x32xf32>
    %193 = vector.broadcast %172 : vector<1x32xf32> to vector<16x32xf32>
    %194 = arith.addf %192, %193 : vector<16x32xf32>
    %c0_120 = arith.constant 0 : index
    %c0_121 = arith.constant 0 : index
    %195 = vector.load %arg26[%c0_120, %c0_121] : memref<16x32xf32, #tpu.memory_space<vmem>>, vector<16x32xf32>
    tpu.vector_store %arg26[%c0_120, %c0_121], %194 {strides = array<i32>} : memref<16x32xf32, #tpu.memory_space<vmem>>, vector<16x32xf32>,
    %c1_i32 = arith.constant 1 : i32
    %196 = arith.cmpi eq, %arg0, %c1_i32 : i32
    %197 = arith.extui %196 : i1 to i32
    %c0_i32_122 = arith.constant 0 : i32
    %198 = arith.cmpi ne, %197, %c0_i32_122 : i32
    scf.if %198 {
      %199 = vector.shape_cast %194 : vector<16x32xf32> to vector<2x8x32xf32>
      %200 = vector.extract_strided_slice %199 {offsets = [0, 0, 0], sizes = [2, 1, 32], strides = [1, 1, 1]} : vector<2x8x32xf32> to vector<2x1x32xf32>
      %201 = vector.shape_cast %200 : vector<2x1x32xf32> to vector<2x32xf32>
      %c0_123 = arith.constant 0 : index
      %c0_124 = arith.constant 0 : index
      %202 = vector.load %arg21[%c0_123, %c0_124] : memref<1x32xf32, #tpu.memory_space<vmem>>, vector<1x32xf32>
      %203 = vector.broadcast %202 : vector<1x32xf32> to vector<2x32xf32>
      %204 = arith.mulf %201, %203 : vector<2x32xf32>
      %c0_125 = arith.constant 0 : index
      %c0_126 = arith.constant 0 : index
      %205 = vector.load %arg22[%c0_125, %c0_126] : memref<32x32xf32, #tpu.memory_space<vmem>>, vector<32x32xf32>
      %cst_127 = arith.constant dense<0.000000e+00> : vector<2x32xf32>
      %206 = tpu.matmul %204, %205, %cst_127 {dimension_numbers = #tpu.dot_dimension_numbers<[1], [0], [0], [1], [0, 0, 1, 1], [], []>} : vector<2x32xf32>, vector<32x32xf32>, vector<2x32xf32> -> vector<2x32xf32>
      %c0_128 = arith.constant 0 : index
      %c0_129 = arith.constant 0 : index
      %207 = vector.load %arg23[%c0_128, %c0_129] : memref<1x32xf32, #tpu.memory_space<vmem>>, vector<1x32xf32>
      %208 = vector.broadcast %207 : vector<1x32xf32> to vector<2x32xf32>
      %209 = arith.addf %206, %208 : vector<2x32xf32>
      %cst_130 = arith.constant 0.000000e+00 : f32
      %210 = vector.broadcast %cst_130 : f32 to vector<2x32xf32>
      %211 = arith.maximumf %209, %210 : vector<2x32xf32>
      %c0_131 = arith.constant 0 : index
      %c0_132 = arith.constant 0 : index
      %212 = vector.load %arg24[%c0_131, %c0_132] : memref<32x128xf32, #tpu.memory_space<vmem>>, vector<32x128xf32>
      %cst_133 = arith.constant dense<0.000000e+00> : vector<2x128xf32>
      %213 = tpu.matmul %211, %212, %cst_133 {dimension_numbers = #tpu.dot_dimension_numbers<[1], [0], [0], [1], [0, 0, 1, 1], [], []>} : vector<2x32xf32>, vector<32x128xf32>, vector<2x128xf32> -> vector<2x128xf32>
      %c0_134 = arith.constant 0 : index
      %c0_135 = arith.constant 0 : index
      %214 = vector.load %arg25[%c0_134, %c0_135] : memref<1x128xf32, #tpu.memory_space<vmem>>, vector<1x128xf32>
      %215 = vector.broadcast %214 : vector<1x128xf32> to vector<2x128xf32>
      %216 = arith.addf %213, %215 : vector<2x128xf32>
      %c0_136 = arith.constant 0 : index
      %c0_137 = arith.constant 0 : index
      %217 = vector.load %arg27[%c0_136, %c0_137] : memref<2x128xf32, #tpu.memory_space<vmem>>, vector<2x128xf32>
      tpu.vector_store %arg27[%c0_136, %c0_137], %216 {strides = array<i32>} : memref<2x128xf32, #tpu.memory_space<vmem>>, vector<2x128xf32>,
    } else {
    }
    return
  }
  func.func @transform_0(%arg0: i32) -> (i32, i32) {
    %c0_i32 = arith.constant 0 : i32
    %c0_i32_0 = arith.constant 0 : i32
    %c0_i32_1 = arith.constant 0 : i32
    return %c0_i32, %c0_i32_0 : i32, i32
  }
  func.func @transform_1(%arg0: i32) -> (i32, i32) {
    %c0_i32 = arith.constant 0 : i32
    %c0_i32_0 = arith.constant 0 : i32
    %c0_i32_1 = arith.constant 0 : i32
    return %c0_i32, %c0_i32_0 : i32, i32
  }
  func.func @transform_2(%arg0: i32) -> (i32, i32) {
    %c0_i32 = arith.constant 0 : i32
    %c0_i32_0 = arith.constant 0 : i32
    %c0_i32_1 = arith.constant 0 : i32
    return %c0_i32, %c0_i32_0 : i32, i32
  }
  func.func @transform_3(%arg0: i32) -> (i32, i32) {
    %c0_i32 = arith.constant 0 : i32
    %c0_i32_0 = arith.constant 0 : i32
    %c0_i32_1 = arith.constant 0 : i32
    return %c0_i32, %c0_i32_0 : i32, i32
  }
  func.func @transform_4(%arg0: i32) -> (i32, i32, i32, i32) {
    %c0_i32 = arith.constant 0 : i32
    %c0_i32_0 = arith.constant 0 : i32
    %c0_i32_1 = arith.constant 0 : i32
    %c0_i32_2 = arith.constant 0 : i32
    return %arg0, %c0_i32, %c0_i32_0, %c0_i32_1 : i32, i32, i32, i32
  }
  func.func @transform_5(%arg0: i32) -> (i32, i32, i32, i32) {
    %c0_i32 = arith.constant 0 : i32
    %c0_i32_0 = arith.constant 0 : i32
    %c0_i32_1 = arith.constant 0 : i32
    %c0_i32_2 = arith.constant 0 : i32
    return %arg0, %c0_i32, %c0_i32_0, %c0_i32_1 : i32, i32, i32, i32
  }
  func.func @transform_6(%arg0: i32) -> (i32, i32, i32, i32) {
    %c0_i32 = arith.constant 0 : i32
    %c0_i32_0 = arith.constant 0 : i32
    %c0_i32_1 = arith.constant 0 : i32
    %c0_i32_2 = arith.constant 0 : i32
    return %arg0, %c0_i32, %c0_i32_0, %c0_i32_1 : i32, i32, i32, i32
  }
  func.func @transform_7(%arg0: i32) -> (i32, i32, i32, i32) {
    %c0_i32 = arith.constant 0 : i32
    %c0_i32_0 = arith.constant 0 : i32
    %c0_i32_1 = arith.constant 0 : i32
    %c0_i32_2 = arith.constant 0 : i32
    return %arg0, %c0_i32, %c0_i32_0, %c0_i32_1 : i32, i32, i32, i32
  }
  func.func @transform_8(%arg0: i32) -> (i32, i32, i32, i32) {
    %c0_i32 = arith.constant 0 : i32
    %c0_i32_0 = arith.constant 0 : i32
    %c0_i32_1 = arith.constant 0 : i32
    %c0_i32_2 = arith.constant 0 : i32
    return %arg0, %c0_i32, %c0_i32_0, %c0_i32_1 : i32, i32, i32, i32
  }
  func.func @transform_9(%arg0: i32) -> (i32, i32, i32, i32) {
    %c0_i32 = arith.constant 0 : i32
    %c0_i32_0 = arith.constant 0 : i32
    %c0_i32_1 = arith.constant 0 : i32
    %c0_i32_2 = arith.constant 0 : i32
    return %arg0, %c0_i32, %c0_i32_0, %c0_i32_1 : i32, i32, i32, i32
  }
  func.func @transform_10(%arg0: i32) -> (i32, i32, i32, i32) {
    %c0_i32 = arith.constant 0 : i32
    %c0_i32_0 = arith.constant 0 : i32
    %c0_i32_1 = arith.constant 0 : i32
    %c0_i32_2 = arith.constant 0 : i32
    return %arg0, %c0_i32, %c0_i32_0, %c0_i32_1 : i32, i32, i32, i32
  }
  func.func @transform_11(%arg0: i32) -> (i32, i32, i32) {
    %c0_i32 = arith.constant 0 : i32
    %c0_i32_0 = arith.constant 0 : i32
    %c0_i32_1 = arith.constant 0 : i32
    return %arg0, %c0_i32, %c0_i32_0 : i32, i32, i32
  }
  func.func @transform_12(%arg0: i32) -> (i32, i32, i32) {
    %c0_i32 = arith.constant 0 : i32
    %c0_i32_0 = arith.constant 0 : i32
    %c0_i32_1 = arith.constant 0 : i32
    return %arg0, %c0_i32, %c0_i32_0 : i32, i32, i32
  }
  func.func @transform_13(%arg0: i32) -> (i32, i32, i32) {
    %c0_i32 = arith.constant 0 : i32
    %c0_i32_0 = arith.constant 0 : i32
    %c0_i32_1 = arith.constant 0 : i32
    return %arg0, %c0_i32, %c0_i32_0 : i32, i32, i32
  }
  func.func @transform_14(%arg0: i32) -> (i32, i32, i32) {
    %c0_i32 = arith.constant 0 : i32
    %c0_i32_0 = arith.constant 0 : i32
    %c0_i32_1 = arith.constant 0 : i32
    return %arg0, %c0_i32, %c0_i32_0 : i32, i32, i32
  }
  func.func @transform_15(%arg0: i32) -> (i32, i32, i32) {
    %c0_i32 = arith.constant 0 : i32
    %c0_i32_0 = arith.constant 0 : i32
    %c0_i32_1 = arith.constant 0 : i32
    return %arg0, %c0_i32, %c0_i32_0 : i32, i32, i32
  }
  func.func @transform_16(%arg0: i32) -> (i32, i32, i32) {
    %c0_i32 = arith.constant 0 : i32
    %c0_i32_0 = arith.constant 0 : i32
    %c0_i32_1 = arith.constant 0 : i32
    return %arg0, %c0_i32, %c0_i32_0 : i32, i32, i32
  }
  func.func @transform_17(%arg0: i32) -> (i32, i32, i32) {
    %c0_i32 = arith.constant 0 : i32
    %c0_i32_0 = arith.constant 0 : i32
    %c0_i32_1 = arith.constant 0 : i32
    return %arg0, %c0_i32, %c0_i32_0 : i32, i32, i32
  }
  func.func @transform_18(%arg0: i32) -> (i32, i32, i32) {
    %c0_i32 = arith.constant 0 : i32
    %c0_i32_0 = arith.constant 0 : i32
    %c0_i32_1 = arith.constant 0 : i32
    return %arg0, %c0_i32, %c0_i32_0 : i32, i32, i32
  }
  func.func @transform_19(%arg0: i32) -> (i32, i32, i32) {
    %c0_i32 = arith.constant 0 : i32
    %c0_i32_0 = arith.constant 0 : i32
    %c0_i32_1 = arith.constant 0 : i32
    return %arg0, %c0_i32, %c0_i32_0 : i32, i32, i32
  }
  func.func @transform_20(%arg0: i32) -> (i32, i32) {
    %c0_i32 = arith.constant 0 : i32
    %c0_i32_0 = arith.constant 0 : i32
    %c0_i32_1 = arith.constant 0 : i32
    return %c0_i32, %c0_i32_0 : i32, i32
  }
  func.func @transform_21(%arg0: i32) -> (i32, i32) {
    %c0_i32 = arith.constant 0 : i32
    %c0_i32_0 = arith.constant 0 : i32
    %c0_i32_1 = arith.constant 0 : i32
    return %c0_i32, %c0_i32_0 : i32, i32
  }
  func.func @transform_22(%arg0: i32) -> (i32, i32) {
    %c0_i32 = arith.constant 0 : i32
    %c0_i32_0 = arith.constant 0 : i32
    %c0_i32_1 = arith.constant 0 : i32
    return %c0_i32, %c0_i32_0 : i32, i32
  }
  func.func @transform_23(%arg0: i32) -> (i32, i32) {
    %c0_i32 = arith.constant 0 : i32
    %c0_i32_0 = arith.constant 0 : i32
    %c0_i32_1 = arith.constant 0 : i32
    return %c0_i32, %c0_i32_0 : i32, i32
  }
  func.func @transform_24(%arg0: i32) -> (i32, i32) {
    %c0_i32 = arith.constant 0 : i32
    %c0_i32_0 = arith.constant 0 : i32
    %c0_i32_1 = arith.constant 0 : i32
    return %c0_i32, %c0_i32_0 : i32, i32
  }
  func.func @transform_25(%arg0: i32) -> (i32, i32) {
    %c0_i32 = arith.constant 0 : i32
    %c0_i32_0 = arith.constant 0 : i32
    %c0_i32_1 = arith.constant 0 : i32
    return %c0_i32, %c0_i32_0 : i32, i32
  }
  func.func @transform_26(%arg0: i32) -> (i32, i32) {
    %c0_i32 = arith.constant 0 : i32
    %c0_i32_0 = arith.constant 0 : i32
    %c0_i32_1 = arith.constant 0 : i32
    return %c0_i32, %c0_i32_0 : i32, i32
  }
}

</mosaic_0001>

<bundles_post_ra>
// kernel: tpu_custom_call.1
= control target key start
LH: loop header
LB: loop body
LE: loop exit
PB: predicated region body
PF: predicated region fallthrough
CT: control target
= control target key end

     0   :  { %s3789_s0 = inlined_call_operand.vmem [shape: f32[16,32], index: 0, kind: input, shape index: {}]   ;;  %s3790_s1 = inlined_call_operand.vmem [shape: f32[2,8], index: 1, kind: input, shape index: {}]   ;;  %s3791_s2 = inlined_call_operand.vmem [shape: f32[1,32], index: 2, kind: input, shape index: {}]   ;;  %s3792_s3 = inlined_call_operand.vmem [shape: f32[1,32], index: 3, kind: input, shape index: {}]   ;;  %s3793_s4 = inlined_call_operand.vmem [shape: bf16[2,2,32,16], index: 4, kind: input, shape index: {}]   ;;  %s3794_s5 = inlined_call_operand.vmem [shape: f32[2,2,1,16], index: 5, kind: input, shape index: {}]   ;;  %s3795_s6 = inlined_call_operand.vmem [shape: bf16[2,2,32,16], index: 6, kind: input, shape index: {}]   ;;  %s3796_s7 = inlined_call_operand.vmem [shape: f32[2,2,1,16], index: 7, kind: input, shape index: {}]   ;;  %s3797_s8 = inlined_call_operand.vmem [shape: bf16[2,2,32,16], index: 8, kind: input, shape index: {}]   ;;  %s3798_s9 = inlined_call_operand.vmem [shape: f32[2,2,1,16], index: 9, kind: input, shape index: {}]   ;;  %s3799_s10 = inlined_call_operand.vmem [shape: bf16[2,2,16,32], index: 10, kind: input, shape index: {}]   ;;  %s3800_s11 = inlined_call_operand.vmem [shape: f32[2,1,32], index: 11, kind: input, shape index: {}]   ;;  %s3801_s12 = inlined_call_operand.vmem [shape: f32[2,1,32], index: 12, kind: input, shape index: {}]   ;;  %s3802_s13 = inlined_call_operand.vmem [shape: f32[2,1,32], index: 13, kind: input, shape index: {}]   ;;  %s3803_s14 = inlined_call_operand.vmem [shape: bf16[2,32,128], index: 14, kind: input, shape index: {}]   ;;  %s3804_s15 = inlined_call_operand.vmem [shape: f32[2,1,128], index: 15, kind: input, shape index: {}]   ;;  %s3805_s16 = inlined_call_operand.vmem [shape: bf16[2,128,32], index: 16, kind: input, shape index: {}]   ;;  %s3806_s17 = inlined_call_operand.vmem [shape: f32[2,1,32], index: 17, kind: input, shape index: {}]   ;;  %s3807_s18 = inlined_call_operand.vmem [shape: f32[2,1,32], index: 18, kind: input, shape index: {}]   ;;  %s3808_s19 = inlined_call_operand.vmem [shape: f32[2,1,32], index: 19, kind: input, shape index: {}]   ;;  %s3809_s20 = inlined_call_operand.vmem [shape: f32[1,32], index: 20, kind: input, shape index: {}]   ;;  %s3810_s21 = inlined_call_operand.vmem [shape: f32[32,32], index: 21, kind: input, shape index: {}]   ;;  %s3811_s22 = inlined_call_operand.vmem [shape: f32[1,32], index: 22, kind: input, shape index: {}]   ;;  %s3812_s23 = inlined_call_operand.vmem [shape: f32[32,128], index: 23, kind: input, shape index: {}]   ;;  %s3813_s24 = inlined_call_operand.vmem [shape: f32[1,128], index: 24, kind: input, shape index: {}]   ;;  %s3814_s25 = inlined_call_operand.hbm [shape: f32[16,32], index: 25, kind: output, shape index: {0}]   ;;  %s3815_s26 = inlined_call_operand.hbm [shape: f32[2,128], index: 26, kind: output, shape index: {1}]  }
   0x1   :  { %3824 = sst [smem:[#allocation13_spill]] %s3789_s0 }
   0x2   :  { %3825 = sst [smem:[#allocation14_spill]] %s3790_s1 }
   0x3   :  { %3826 = sst [smem:[#allocation15_spill]] %s3791_s2 }
   0x4   :  { %3827 = sst [smem:[#allocation16_spill]] %s3792_s3 }
   0x5   :  { %3828 = sst [smem:[#allocation17_spill]] %s3793_s4 }
   0x6   :  { %3829 = sst [smem:[#allocation18_spill]] %s3794_s5 }
   0x7   :  { %3830 = sst [smem:[#allocation19_spill]] %s3795_s6 }
   0x8   :  { %3831 = sst [smem:[#allocation20_spill]] %s3796_s7 }
   0x9   :  { %3832 = sst [smem:[#allocation21_spill]] %s3797_s8 }
   0xa   :  { %3833 = sst [smem:[#allocation22_spill]] %s3798_s9 }
   0xb   :  { %3834 = sst [smem:[#allocation23_spill]] %s3799_s10 }
   0xc   :  { %3835 = sst [smem:[#allocation24_spill]] %s3809_s20 }
   0xd   :  { %3836 = sst [smem:[#allocation25_spill]] %s3810_s21 }
   0xe   :  { %3837 = sst [smem:[#allocation26_spill]] %s3811_s22 }
   0xf   :  { %3838 = sst [smem:[#allocation27_spill]] %s3812_s23 }
  0x10   :  { %3839 = sst [smem:[#allocation28_spill]] %s3813_s24 }
  0x11   :  { %3840 = sst [smem:[#allocation29_spill]] %s3814_s25 }
  0x12   :  { %3841 = sst [smem:[#allocation30_spill]] %s3815_s26 }
  0x13   :  { %32 = vsyncpa [#allocation3], 0 }
  0x14   :  { %33 = vsyncpa [#allocation5], 0  ;;  %s3399_s27 = smov 0  }
  0x15 LB: > { %3842 = sst [smem:[#allocation8_spill]] %s3252_s27  ;;  %s3405_s3 = sadd.s32 4294967295, %s3252_s27   ;;  %s3252_s27 = sphi %s3399_s27, %s39_s27  }
  0x16   : > { %p2777_p0 = scmp.ge.s32.totalorder %s3252_s27, 1  ;;  %p840_p1 = scmp.lt.s32.totalorder %s3252_s27, 3 }
  0x18   : > { %p841_p2 = pnand %p2777_p0, %p840_p1 }
  0x1a   : > { %844 = sbr.rel (%p841_p2) target bundleno = 3720 (0xe88), region = 120 }
  0x1f   : > { %p963_p3 = scmp.lt.s32.totalorder %s3405_s3, 1  ;;  %s3843_s0 = sld [smem:[#allocation17_spill]] }
  0x20   : > { %s3845_s5 = sld [smem:[#allocation18_spill]]  ;;  %p2793_p4 = scmp.ne.s32.totalorder %s3405_s3, 0 }
  0x21   : > { %s3411_s7 = scalar_select %p963_p3, %s3405_s3, 1 }
  0x22   : > { %s3847_s27 = sld [smem:[#allocation19_spill]] }
  0x23   : > { %s2880_s28 = sshll.u32 %s3411_s7, 5  ;;  %s2780_s8 = sshll.u32 %s3411_s7, 1 }
  0x24   : > { %s3849_s22 = sld [smem:[#allocation20_spill]]  ;;  %s1011_s1 = scalar_lea.vmem %s3804_s15, %s3411_s7 }
  0x25   : > { %s3418_s9 = scalar_lea.vmem %s3843_s0, %s2880_s28  ;;  %s3851_s0 = sld [smem:[#allocation21_spill]] }
  0x26   : > { %3844 = sst [smem:[#allocation9_spill]] %s3418_s9  ;;  %s3423_s10 = scalar_lea.vmem %s3845_s5, %s2780_s8 }
  0x27   : > { %3846 = sst [smem:[#allocation10_spill]] %s3423_s10  ;;  %s2883_s10 = sshll.u32 %s3411_s7, 4 }
  0x28   : > { %s3428_s26 = scalar_lea.vmem %s3847_s27, %s2880_s28  ;;  %s3852_s5 = sld [smem:[#allocation22_spill]] }
  0x29   : > { %3848 = sst [smem:[#allocation11_spill]] %s3428_s26  ;;  %s3466_s2 = scalar_lea.vmem %s3803_s14, %s2883_s10 }
  0x2a   : > { %s3433_s23 = scalar_lea.vmem %s3849_s22, %s2780_s8  ;;  %s3853_s24 = sld [smem:[#allocation23_spill]] }
  0x2b   : > { %3850 = sst [smem:[#allocation12_spill]] %s3433_s23  ;;  %s3438_s20 = scalar_lea.vmem %s3851_s0, %s2880_s28 }
  0x2c   : > { %s2885_s26 = sshll.u32 %s3411_s7, 6  ;;  %s1019_s4 = scalar_lea.vmem %s3806_s17, %s3411_s7 }
  0x2d   : > { %s3476_s27 = scalar_lea.vmem %s3805_s16, %s2885_s26  ;;  %s1025_s28 = scalar_lea.vmem %s3808_s19, %s3411_s7 }
  0x2e   : > { %s3443_s21 = scalar_lea.vmem %s3852_s5, %s2780_s8  ;;  %s1022_s8 = scalar_lea.vmem %s3807_s18, %s3411_s7 }
  0x2f   : > { %1030 = sbr.rel (%p2793_p4) target bundleno = 367 (0x16f), region = 124  ;;  %s3854_s9 = sld [smem:[#allocation13_spill]] (!%p2793_p4) }
  0x30   : > { %s3453_s22 = scalar_lea.vmem %s3853_s24, %s2883_s10  ;;  %s3855_s25 = sld [smem:[#allocation15_spill]] (!%p2793_p4) }
  0x31   : > { %s3856_s30 = sld [smem:[#allocation16_spill]] (!%p2793_p4) }
  0x34   : > { %vm1035_vm0 = vcmask 261120   ;;  %v3254_v14 = vmov 0.0  }
  0x35   : > { %v1031_v0 = vld [vmem:[%s3854_s9] sm:$0xff]  ;;  %v1032_v1 = vld [vmem:[%s3854_s9 + $0x8] sm:$0xff]  ;;  %1081 = vst [vmem:[#allocation4] sm:$0x3] %v3254_v14 }
  0x36   : > { %v1036_v2 = vsel %vm1035_vm0, %v1031_v0, 0.0  ;;  %v1039_v3 = vsel %vm1035_vm0, %v1032_v1, 0.0  ;;  %v2794_v22 = vld [vmem:[%s3855_s25] ss:$0 sm:$0xff] }
  0x37   : > { %1037 = vadd.xlane.f32.xlu0 %v1036_v2  ;;  %v2795_v24 = vld [vmem:[%s3856_s30] ss:$0 sm:$0xff] }
  0x3b   : > { %1040 = vadd.xlane.f32.xlu0 %v1039_v3 }
  0xc0   : > { %v1038_v4 = vpop.xlane.xlu0 %1037 }
  0xc1   : > { %v1043_v5 = vmul.f32 0.03125, %v1038_v4 }
  0xc3   : > { %v1045_v6 = vsub.f32 %v1031_v0, %v1043_v5 }
  0xc4   : > { %v1041_v7 = vpop.xlane.xlu0 %1040 }
  0xc5   : > { %v1044_v8 = vmul.f32 0.03125, %v1041_v7  ;;  %v1047_v9 = vmul.f32 %v1045_v6, %v1045_v6 }
  0xc7   : > { %v1046_v10 = vsub.f32 %v1032_v1, %v1044_v8  ;;  %v1049_v11 = vsel %vm1035_vm0, %v1047_v9, 0.0 }
  0xc8   : > { %1050 = vadd.xlane.f32.xlu1 %v1049_v11 }
  0xc9   : > { %v1048_v12 = vmul.f32 %v1046_v10, %v1046_v10 }
  0xcb   : > { %v1052_v13 = vsel %vm1035_vm0, %v1048_v12, 0.0 }
  0xcc   : > { %1053 = vadd.xlane.f32.xlu1 %v1052_v13 }
 0x151   : > { %v1051_v15 = vpop.xlane.xlu1 %1050 }
 0x152   : > { %v1055_v16 = vmul.f32 0.03125, %v1051_v15 }
 0x154   : > { %v1057_v17 = vadd.f32 1e-12, %v1055_v16 }
 0x155   : > { %v1054_v18 = vpop.xlane.xlu1 %1053 }
 0x156   : > { %3134 = vrsqrt.f32 %v1057_v17  ;;  %v1056_v19 = vmul.f32 0.03125, %v1054_v18 }
 0x158   : > { %v1058_v20 = vadd.f32 1e-12, %v1056_v19 }
 0x15a   : > { %3136 = vrsqrt.f32 %v1058_v20 }
 0x163   : > { %v3135_v21 = vpop.eup %3134 }
 0x164   : > { %v1061_v23 = vmul.f32 %v3135_v21, %v1045_v6 }
 0x166   : > { %v1069_v25 = vmul.f32 %v2794_v22, %v1061_v23 }
 0x167   : > { %v3137_v26 = vpop.eup %3136 }
 0x168   : > { %v1077_v27 = vadd.f32 %v2795_v24, %v1069_v25  ;;  %v1062_v28 = vmul.f32 %v3137_v26, %v1046_v10 }
 0x16a   : > { %1079 = vst.msk [vmem:[#allocation2] sm:$0xff] %vm1035_vm0, %v1077_v27  ;;  %v1070_v29 = vmul.f32 %v2794_v22, %v1062_v28 }
 0x16c   : > { %v1078_v30 = vadd.f32 %v2795_v24, %v1070_v29 }
 0x16e   : > { %1080 = vst.msk [vmem:[#allocation2 + $0x8] sm:$0xff] %vm1035_vm0, %v1078_v30 }
 0x16f PF: > { %s3857_s5 = sld [smem:[#allocation9_spill]]  ;;  %v3255_v32 = vmov 0.0   ;;  %vm3256_vm1 = vmmov 0   ;;  %vm1132_vm2 = vcmask 261120   ;;  %v3142_v39 = vld [vmem:[%s3438_s20 + $0x8] sm:$0xff]   ;;  %v3143_v40 = vld [vmem:[%s3438_s20] sm:$0xff]   ;;  %v1098_v12 = vlaneseq }
 0x170   : > { %s3858_s6 = sld [smem:[#allocation11_spill]]  ;;  %2946 = vmatprep.subr.bf16.mxu0 %v3255_v32  ;;  %2970 = vmatprep.subr.bf16.mxu1 %v3255_v32  ;;  %vm1323_vm3 = vcmask 130048   ;;  %v2805_v63 = vld [vmem:[%s3443_s21] ss:$0 sm:$0xff]  ;;  %vm1444_vm4 = vcmask 1043456   ;;  %vm1416_vm5 = vcmask 64512  }
 0x171   : > { %2950 = vmatprep.mubr.msk.bf16.mxu0 %vm3256_vm1, %v3255_v32  ;;  %v3515_v34 = vld [vmem:[#allocation2] sm:$0xff]  ;;  %2972 = vmatprep.mubr.msk.bf16.mxu1 %vm3256_vm1, %v3255_v32  ;;  %s3859_s26 = sld [smem:[#allocation12_spill]]  ;;  %v3257_v10 = vmov 1966171168   ;;  %v1099_v14 = vshrl.u32 %v1098_v12, 7  ;;  %p2868_p5 = scmp.ne.s32.totalorder %s3405_s3, 1 }
 0x172   : > { %s3860_s24 = sld [smem:[#allocation10_spill]]  ;;  %v1096_v11 = vunpack.c.l.s4 %v3257_v10 }
 0x173   : > { %s3861_s25 = sld [smem:[#allocation14_spill]]  ;;  %v1315_v20 = vsub.s32 0, %v1099_v14 }
 0x174   : > { %v1097_v13 = vunpack.c.0.s8 %v1096_v11  ;;  %s3866_s10 = sld [smem:[#allocation24_spill]] (!%p2868_p5) }
 0x175   : > { %v3138_v31 = vld [vmem:[%s3857_s5 + $0x8] sm:$0xff]   ;;  %v3139_v33 = vld [vmem:[%s3857_s5] sm:$0xff]  }
 0x176   : > { %2947 = vmatpush3.bf16.msra.mxu0 %v3138_v31  ;;  %v3517_v35 = vld [vmem:[#allocation2 + $0x8] sm:$0xff]  ;;  %v3141_v38 = vld [vmem:[%s3858_s6] sm:$0xff]   ;;  %v1100_v17 = vsub.s32 %v1097_v13, %v1099_v14 }
 0x177   : > { %2948 = vmatprep.subr.bf16.mxu0 %v3255_v32  ;;  %v3140_v36 = vld [vmem:[%s3858_s6 + $0x8] sm:$0xff]   ;;  %v3525_v37 = vpack.c.bf16 %v3517_v35, %v3515_v34  ;;  %v2801_v45 = vld [vmem:[%s3859_s26] ss:$0 sm:$0xff] }
 0x178   : > { %v2797_v46 = vld [vmem:[%s3860_s24] ss:$0 sm:$0xff]  ;;  %v2818_v11 = vld [vmem:[%s3860_s24 + $0x1] ss:$0 sm:$0xff] }
 0x179   : > { %v2796_v15 = vld.sshfl [vmem:[%s3861_s25] sm:$0x11 pattern:$0x75316420] }
 0x17a   : > { %2949 = vmatpush3.bf16.msra.mxu0 %v3139_v33  ;;  %v1094_v16 = vcombine.high %v2796_v15, %v2796_v15  ;;  %v1101_v19 = vrot.slane %v2796_v15, %v1100_v17 }
 0x17b   : > { %2954 = vmatprep.subr.bf16.mxu0 %v3255_v32 }
 0x17c   : > { %v1108_v18 = vrot.slane %v1094_v16, %v1100_v17  ;;  %v3569_v24 = vrot.slane %v1101_v19, %v1315_v20 }
 0x17d   : > { %2951 = vmatmul.mubr.msk.bf16.vlgmr.msra.gmra.mxu0 %vm1132_vm2, %v3525_v37 }
 0x17e   : > { %2955 = vmatpush3.bf16.msra.mxu0 %v3140_v36  ;;  %2958 = vmatprep.mubr.msk.bf16.mxu0 %vm3256_vm1, %v3255_v32  ;;  %v3567_v22 = vrot.slane %v1108_v18, %v1315_v20 }
 0x17f   : > { %2956 = vmatprep.subr.bf16.mxu0 %v3255_v32 }
 0x182   : > { %2957 = vmatpush3.bf16.msra.mxu0 %v3141_v38 }
 0x183   : > { %2962 = vmatprep.subr.bf16.mxu0 %v3255_v32 }
 0x185   : > { %2959 = vmatmul.mubr.msk.bf16.vlgmr.msra.gmra.mxu0 %vm1132_vm2, %v3525_v37 }
 0x186   : > { %2966 = vmatprep.mubr.msk.bf16.mxu0 %vm3256_vm1, %v3255_v32  ;;  %2963 = vmatpush3.bf16.msra.mxu0 %v3142_v39 }
 0x187   : > { %2964 = vmatprep.subr.bf16.mxu0 %v3255_v32 }
 0x18a   : > { %2965 = vmatpush3.bf16.msra.mxu0 %v3143_v40 }
 0x18b   : > { %2976 = vmatprep.subr.bf16.mxu0 %v3255_v32 }
 0x18d   : > { %2967 = vmatmul.mubr.msk.bf16.vlgmr.msra.gmra.mxu0 %vm1132_vm2, %v3525_v37 }
 0x18e   : > { %2978 = vmatprep.mubr.msk.bf16.mxu0 %vm3256_vm1, %v3255_v32 }
 0x23d   : > { %v1170_v41 = vpop.f32.mrf.mxu0 }
 0x23e   : > { %v1171_v50 = vadd.f32 %v2797_v46, %v1170_v41 }
 0x23f   : > { %v2952_v42 = vpop.f32.mrf.mxu0 }
 0x240   : > { %v1305_v56 = vmul.f32 0.25, %v1171_v50 }
 0x241   : > { %v1173_v43 = vpop.f32.mrf.mxu0 }
 0x242   : > { %v1174_v57 = vadd.f32 %v2797_v46, %v1173_v43  ;;  %v1307_v60 = vpack.c.bf16 %v1305_v56, %v1305_v56 }
 0x243   : > { %v2953_v44 = vpop.f32.mrf.mxu0 }
 0x244   : > { %v1306_v61 = vmul.f32 0.25, %v1174_v57  ;;  %v3145_v57 = vld [vmem:[%s3857_s5 + $0x18] sm:$0xff]  }
 0x245   : > { %v1234_v47 = vpop.f32.mrf.mxu0 }
 0x246   : > { %v1235_v48 = vadd.f32 %v2801_v45, %v1234_v47  ;;  %v1308_v62 = vpack.c.bf16 %v1306_v61, %v1306_v61  ;;  %v3148_v61 = vld [vmem:[%s3438_s20 + $0x18] sm:$0xff]  }
 0x247   : > { %v2960_v49 = vpop.f32.mrf.mxu0 }
 0x248   : > { %v1309_v51 = vpack.c.bf16 %v1235_v48, %v1235_v48 }
 0x249   : > { %v1237_v52 = vpop.f32.mrf.mxu0 }
 0x24a   : > { %v1238_v53 = vadd.f32 %v2801_v45, %v1237_v52  ;;  %v1328_v54 = vsel %vm1323_vm3, %v1309_v51, 0 }
 0x24b   : > { %v2961_v55 = vpop.f32.mrf.mxu0  ;;  %2971 = vmatpush3.bf16.xpose.msra.mxu1 %v1328_v54 }
 0x24c   : > { %v1310_v58 = vpack.c.bf16 %v1238_v53, %v1238_v53  ;;  %2982 = vmatprep.subr.bf16.mxu1 %v3255_v32  ;;  %v3144_v53 = vld [vmem:[%s3858_s6 + $0x18] sm:$0xff]  }
 0x24d   : > { %v1298_v0 = vpop.f32.mrf.mxu0 }
 0x24e   : > { %v1374_v59 = vsel %vm1323_vm3, %v1310_v58, 0  ;;  %v1299_v1 = vadd.f32 %v2805_v63, %v1298_v0  ;;  %v3146_v58 = vld [vmem:[%s3858_s6 + $0x10] sm:$0xff]   ;;  %s3864_s6 = scalar_lea.vmem %s3802_s13, %s3411_s7 }
 0x24f   : > { %2977 = vmatpush3.bf16.xpose.msra.mxu0 %v1374_v59  ;;  %v2968_v2 = vpop.f32.mrf.mxu0 }
 0x250   : > { %2988 = vmatprep.subr.bf16.mxu0 %v3255_v32  ;;  %v1311_v3 = vpack.c.bf16 %v1299_v1, %v1299_v1 }
 0x251   : > { %v1301_v4 = vpop.f32.mrf.mxu0 }
 0x252   : > { %2973 = vmatmul.mubr.msk.bf16.vlgmr.msra.gmra.mxu1 %vm1323_vm3, %v1307_v60  ;;  %v1446_v5 = vsel %vm1444_vm4, %v1311_v3, 0  ;;  %v1302_v6 = vadd.f32 %v2805_v63, %v1301_v4  ;;  %v3147_v60 = vld [vmem:[%s3857_s5 + $0x10] sm:$0xff]   ;;  %s3867_s5 = sld [smem:[#allocation27_spill]] (!%p2868_p5) }
 0x253   : > { %2984 = vmatprep.mubr.msk.bf16.mxu1 %vm3256_vm1, %v3255_v32  ;;  %v2969_v7 = vpop.f32.mrf.mxu0  ;;  %2983 = vmatpush3.bf16.msra.mxu1 %v1446_v5 }
 0x254   : > { %v1312_v8 = vpack.c.bf16 %v1302_v6, %v1302_v6  ;;  %2994 = vmatprep.subr.bf16.mxu1 %v3255_v32  ;;  %v2827_v6 = vld [vmem:[%s3859_s26 + $0x1] ss:$0 sm:$0xff] }
 0x256   : > { %2979 = vmatmul.mubr.msk.bf16.vlgmr.msra.gmra.mxu0 %vm1323_vm3, %v1308_v62  ;;  %v1492_v9 = vsel %vm1444_vm4, %v1312_v8, 0  ;;  %v3149_v62 = vld [vmem:[%s3438_s20 + $0x10] sm:$0xff]  }
 0x257   : > { %2990 = vmatprep.mubr.msk.bf16.mxu0 %vm3256_vm1, %v3255_v32  ;;  %2989 = vmatpush3.bf16.msra.mxu0 %v1492_v9 }
 0x258   : > { %3002 = vmatprep.subr.bf16.mxu0 %v3255_v32 }
 0x312   : > { %v1364_v21 = vpop.f32.mrf.mxu1 }
 0x313   : > { %v1365_v30 = vadd.f32 %v1364_v21, %v3569_v24 }
 0x314   : > { %v2974_v23 = vpop.f32.mrf.mxu1 }
 0x315   : > { %v1417_v38 = vsel %vm1416_vm5, %v1365_v30, -inf }
 0x316   : > { %v1367_v25 = vpop.f32.mrf.mxu1  ;;  %v1410_v26 = vpop.f32.mrf.mxu0 }
 0x317   : > { %v1411_v27 = vadd.f32 %v1410_v26, %v3567_v22 }
 0x318   : > { %v2975_v28 = vpop.f32.mrf.mxu1  ;;  %v2980_v29 = vpop.f32.mrf.mxu0 }
 0x319   : > { %v1420_v31 = vsel %vm1416_vm5, %v1411_v27, -inf }
 0x31a   : > { %1421 = vmax.xlane.f32.xlu0 %v1420_v31  ;;  %v1413_v33 = vpop.f32.mrf.mxu0  ;;  %v2836_v31 = vld [vmem:[%s3443_s21 + $0x1] ss:$0 sm:$0xff]  ;;  %s3865_s21 = sld [smem:[#allocation25_spill]] (!%p2868_p5) }
 0x31c   : > { %v2981_v36 = vpop.f32.mrf.mxu0 }
 0x31e   : > { %1418 = vmax.xlane.f32.xlu0 %v1417_v38 }
 0x3a3   : > { %v1422_v39 = vpop.xlane.xlu0 %1421 }
 0x3a4   : > { %v1424_v40 = vsub.f32 %v1411_v27, %v1422_v39 }
 0x3a6   : > { %v1427_v41 = vmul.f32 1.442695, %v1424_v40 }
 0x3a7   : > { %v1419_v42 = vpop.xlane.xlu0 %1418 }
 0x3a8   : > { %3162 = vpow2.f32 %v1427_v41  ;;  %v1423_v43 = vsub.f32 %v1365_v30, %v1419_v42 }
 0x3aa   : > { %v1425_v44 = vmul.f32 1.442695, %v1423_v43 }
 0x3ac   : > { %3164 = vpow2.f32 %v1425_v44 }
 0x3b5   : > { %v3163_v45 = vpop.eup %3162 }
 0x3b6   : > { %v1432_v46 = vsel %vm1416_vm5, %v3163_v45, 0.0 }
 0x3b7   : > { %1433 = vadd.xlane.f32.xlu1 %v1432_v46 }
 0x3b9   : > { %v3165_v47 = vpop.eup %3164 }
 0x3ba   : > { %v1429_v48 = vsel %vm1416_vm5, %v3165_v47, 0.0 }
 0x3bb   : > { %1430 = vadd.xlane.f32.xlu1 %v1429_v48 }
 0x440   : > { %v1434_v49 = vpop.xlane.xlu1 %1433 }
 0x441   : > { %3166 = vrcp.f32 %v1434_v49 }
 0x444   : > { %v1431_v50 = vpop.xlane.xlu1 %1430 }
 0x445   : > { %3168 = vrcp.f32 %v1431_v50 }
 0x44e   : > { %v3167_v51 = vpop.eup %3166 }
 0x44f   : > { %v1438_v52 = vmul.f32 %v3167_v51, %v3163_v45 }
 0x451   : > { %v1440_v54 = vpack.c.bf16 %v1438_v52, %v1438_v52 }
 0x452   : > { %v3169_v55 = vpop.eup %3168 }
 0x453   : > { %2991 = vmatmul.mubr.msk.bf16.vlgmr.msra.gmra.mxu0 %vm1416_vm5, %v1440_v54  ;;  %v1437_v56 = vmul.f32 %v3169_v55, %v3165_v47 }
 0x454   : > { %3003 = vmatpush3.bf16.msra.mxu0 %v3144_v53  ;;  %3006 = vmatprep.mubr.msk.bf16.mxu0 %vm3256_vm1, %v3255_v32 }
 0x455   : > { %v1439_v59 = vpack.c.bf16 %v1437_v56, %v1437_v56  ;;  %3004 = vmatprep.subr.bf16.mxu0 %v3255_v32 }
 0x457   : > { %2985 = vmatmul.mubr.msk.bf16.vlgmr.msra.gmra.mxu1 %vm1416_vm5, %v1439_v59 }
 0x458   : > { %2995 = vmatpush3.bf16.msra.mxu1 %v3145_v57  ;;  %3005 = vmatpush3.bf16.msra.mxu0 %v3146_v58 }
 0x459   : > { %2996 = vmatprep.subr.bf16.mxu1 %v3255_v32  ;;  %2998 = vmatprep.mubr.msk.bf16.mxu1 %vm3256_vm1, %v3255_v32 }
 0x45a   : > { %3018 = vmatprep.subr.bf16.mxu0 %v3255_v32 }
 0x45b   : > { %3007 = vmatmul.mubr.msk.bf16.vlgmr.msra.gmra.mxu0 %vm1132_vm2, %v3525_v37 }
 0x45c   : > { %2997 = vmatpush3.bf16.msra.mxu1 %v3147_v60  ;;  %3020 = vmatprep.mubr.msk.bf16.mxu0 %vm3256_vm1, %v3255_v32 }
 0x45d   : > { %3010 = vmatprep.subr.bf16.mxu1 %v3255_v32 }
 0x45f   : > { %2999 = vmatmul.mubr.msk.bf16.vlgmr.msra.gmra.mxu1 %vm1132_vm2, %v3525_v37 }
 0x460   : > { %3014 = vmatprep.mubr.msk.bf16.mxu1 %vm3256_vm1, %v3255_v32  ;;  %3011 = vmatpush3.bf16.msra.mxu1 %v3148_v61 }
 0x461   : > { %3012 = vmatprep.subr.bf16.mxu1 %v3255_v32 }
 0x464   : > { %3013 = vmatpush3.bf16.msra.mxu1 %v3149_v62 }
 0x465   : > { %3024 = vmatprep.subr.bf16.mxu1 %v3255_v32 }
 0x467   : > { %3015 = vmatmul.mubr.msk.bf16.vlgmr.msra.gmra.mxu1 %vm1132_vm2, %v3525_v37 }
 0x468   : > { %3026 = vmatprep.mubr.msk.bf16.mxu1 %vm3256_vm1, %v3255_v32 }
 0x513   : > { %v3607_v63 = vpop.f32.mrf.mxu0 }
 0x515   : > { %v2992_v0 = vpop.f32.mrf.mxu0 }
 0x517   : > { %v3609_v1 = vpop.f32.mrf.mxu1  ;;  %v1531_v2 = vpop.f32.mrf.mxu0 }
 0x518   : > { %v1534_v3 = vpack.c.bf16 %v3607_v63, %v3609_v1 }
 0x519   : > { %v2986_v4 = vpop.f32.mrf.mxu1  ;;  %v2993_v5 = vpop.f32.mrf.mxu0 }
 0x51b   : > { %v1485_v7 = vpop.f32.mrf.mxu1  ;;  %v1662_v8 = vpop.f32.mrf.mxu0 }
 0x51c   : > { %v1663_v9 = vadd.f32 %v2827_v6, %v1662_v8 }
 0x51d   : > { %v2987_v10 = vpop.f32.mrf.mxu1  ;;  %v3008_v37 = vpop.f32.mrf.mxu0 }
 0x51e   : > { %v1739_v12 = vpack.c.bf16 %v1663_v9, %v1663_v9 }
 0x51f   : > { %v1596_v13 = vpop.f32.mrf.mxu1  ;;  %v1665_v14 = vpop.f32.mrf.mxu0 }
 0x520   : > { %v1747_v15 = vsel %vm1323_vm3, %v1739_v12, 0  ;;  %v1597_v16 = vadd.f32 %v2818_v11, %v1596_v13  ;;  %v1666_v17 = vadd.f32 %v2827_v6, %v1665_v14  ;;  %v3151_v13 = vld [vmem:[%s3453_s22 + $0x8] sm:$0xff]  }
 0x521   : > { %v3000_v18 = vpop.f32.mrf.mxu1  ;;  %v3009_v19 = vpop.f32.mrf.mxu0  ;;  %3019 = vmatpush3.bf16.xpose.msra.mxu0 %v1747_v15 }
 0x522   : > { %v1735_v20 = vmul.f32 0.25, %v1597_v16  ;;  %v1740_v21 = vpack.c.bf16 %v1666_v17, %v1666_v17  ;;  %3030 = vmatprep.subr.bf16.mxu0 %v3255_v32 }
 0x523   : > { %v1599_v23 = vpop.f32.mrf.mxu1 }
 0x524   : > { %v1737_v25 = vpack.c.bf16 %v1735_v20, %v1735_v20  ;;  %v1793_v26 = vsel %vm1323_vm3, %v1740_v21, 0  ;;  %v1600_v27 = vadd.f32 %v2818_v11, %v1599_v23  ;;  %v3150_v11 = vld [vmem:[%s3453_s22] sm:$0xff]   ;;  %s3862_s22 = scalar_lea.vmem %s3800_s11, %s3411_s7 }
 0x525   : > { %v3001_v28 = vpop.f32.mrf.mxu1  ;;  %3025 = vmatpush3.bf16.xpose.msra.mxu1 %v1793_v26 }
 0x526   : > { %v1736_v29 = vmul.f32 0.25, %v1600_v27  ;;  %3036 = vmatprep.subr.bf16.mxu1 %v3255_v32  ;;  %v2850_v27 = vld [vmem:[%s3862_s22] ss:$0 sm:$0xff] }
 0x527   : > { %v1728_v33 = vpop.f32.mrf.mxu1 }
 0x528   : > { %3021 = vmatmul.mubr.msk.bf16.vlgmr.msra.gmra.mxu0 %vm1323_vm3, %v1737_v25  ;;  %v1738_v30 = vpack.c.bf16 %v1736_v29, %v1736_v29  ;;  %v1729_v36 = vadd.f32 %v2836_v31, %v1728_v33 }
 0x529   : > { %3032 = vmatprep.mubr.msk.bf16.mxu0 %vm3256_vm1, %v3255_v32  ;;  %v3016_v38 = vpop.f32.mrf.mxu1 }
 0x52a   : > { %v1741_v39 = vpack.c.bf16 %v1729_v36, %v1729_v36 }
 0x52b   : > { %v1731_v40 = vpop.f32.mrf.mxu1 }
 0x52c   : > { %3027 = vmatmul.mubr.msk.bf16.vlgmr.msra.gmra.mxu1 %vm1323_vm3, %v1738_v30  ;;  %v1863_v41 = vsel %vm1444_vm4, %v1741_v39, 0  ;;  %v1732_v42 = vadd.f32 %v2836_v31, %v1731_v40 }
 0x52d   : > { %3038 = vmatprep.mubr.msk.bf16.mxu1 %vm3256_vm1, %v3255_v32  ;;  %v3017_v43 = vpop.f32.mrf.mxu1  ;;  %3031 = vmatpush3.bf16.msra.mxu0 %v1863_v41 }
 0x52e   : > { %v1742_v44 = vpack.c.bf16 %v1732_v42, %v1732_v42  ;;  %3042 = vmatprep.subr.bf16.mxu0 %v3255_v32 }
 0x530   : > { %v1909_v45 = vsel %vm1444_vm4, %v1742_v44, 0 }
 0x531   : > { %3037 = vmatpush3.bf16.msra.mxu1 %v1909_v45 }
 0x532   : > { %3048 = vmatprep.subr.bf16.mxu1 %v3255_v32 }
 0x5e8   : > { %v1783_v46 = vpop.f32.mrf.mxu0 }
 0x5e9   : > { %v1784_v47 = vadd.f32 %v1783_v46, %v3569_v24 }
 0x5ea   : > { %v3022_v48 = vpop.f32.mrf.mxu0 }
 0x5eb   : > { %v1835_v49 = vsel %vm1416_vm5, %v1784_v47, -inf }
 0x5ec   : > { %v1829_v50 = vpop.f32.mrf.mxu1  ;;  %1836 = vmax.xlane.f32.xlu0 %v1835_v49  ;;  %v1786_v51 = vpop.f32.mrf.mxu0 }
 0x5ed   : > { %v1830_v52 = vadd.f32 %v1829_v50, %v3567_v22 }
 0x5ee   : > { %v3023_v53 = vpop.f32.mrf.mxu0  ;;  %v3028_v54 = vpop.f32.mrf.mxu1 }
 0x5ef   : > { %v1838_v55 = vsel %vm1416_vm5, %v1830_v52, -inf }
 0x5f0   : > { %1839 = vmax.xlane.f32.xlu1 %v1838_v55  ;;  %v1832_v56 = vpop.f32.mrf.mxu1 }
 0x5f2   : > { %v3029_v57 = vpop.f32.mrf.mxu1 }
 0x675   : > { %v1837_v58 = vpop.xlane.xlu0 %1836 }
 0x676   : > { %v1841_v59 = vsub.f32 %v1784_v47, %v1837_v58 }
 0x678   : > { %v1843_v60 = vmul.f32 1.442695, %v1841_v59 }
 0x679   : > { %v1840_v61 = vpop.xlane.xlu1 %1839 }
 0x67a   : > { %3170 = vpow2.f32 %v1843_v60  ;;  %v1842_v24 = vsub.f32 %v1830_v52, %v1840_v61  ;;  %v3153_v52 = vld [vmem:[%s3466_s2] sm:$0xff]  }
 0x67c   : > { %v1845_v62 = vmul.f32 1.442695, %v1842_v24 }
 0x67e   : > { %3172 = vpow2.f32 %v1845_v62 }
 0x687   : > { %v3171_v0 = vpop.eup %3170 }
 0x688   : > { %v1847_v2 = vsel %vm1416_vm5, %v3171_v0, 0.0 }
 0x689   : > { %1848 = vadd.xlane.f32.xlu0 %v1847_v2  ;;  %v2852_v2 = vld [vmem:[%s3864_s6] ss:$0 sm:$0xff] }
 0x68b   : > { %v3173_v22 = vpop.eup %3172 }
 0x68c   : > { %v1850_v4 = vsel %vm1416_vm5, %v3173_v22, 0.0 }
 0x68d   : > { %1851 = vadd.xlane.f32.xlu1 %v1850_v4 }
 0x712   : > { %v1849_v5 = vpop.xlane.xlu0 %1848 }
 0x713   : > { %3174 = vrcp.f32 %v1849_v5 }
 0x716   : > { %v1852_v6 = vpop.xlane.xlu1 %1851 }
 0x717   : > { %3176 = vrcp.f32 %v1852_v6 }
 0x720   : > { %v3175_v7 = vpop.eup %3174 }
 0x721   : > { %v1855_v8 = vmul.f32 %v3175_v7, %v3171_v0  ;;  %v3154_v7 = vld [vmem:[%s3476_s27 + $0x38] sm:$0xff]  }
 0x723   : > { %v1857_v9 = vpack.c.bf16 %v1855_v8, %v1855_v8  ;;  %v3155_v8 = vld [vmem:[%s3476_s27 + $0x30] sm:$0xff]  }
 0x724   : > { %v3177_v10 = vpop.eup %3176 }
 0x725   : > { %3033 = vmatmul.mubr.msk.bf16.vlgmr.msra.gmra.mxu0 %vm1416_vm5, %v1857_v9  ;;  %v1856_v37 = vmul.f32 %v3177_v10, %v3173_v22  ;;  %v3156_v9 = vld [vmem:[%s3476_s27 + $0x28] sm:$0xff]   ;;  %v3157_v10 = vld [vmem:[%s3476_s27 + $0x20] sm:$0xff]  }
 0x726   : > { %3044 = vmatprep.mubr.msk.bf16.mxu0 %vm3256_vm1, %v3255_v32  ;;  %3043 = vmatpush3.bf16.msra.mxu0 %v3151_v13  ;;  %v3161_v13 = vld [vmem:[%s3476_s27] sm:$0xff]  }
 0x727   : > { %v1858_v12 = vpack.c.bf16 %v1856_v37, %v1856_v37  ;;  %3054 = vmatprep.subr.bf16.mxu0 %v3255_v32  ;;  %v3158_v37 = vld [vmem:[%s3476_s27 + $0x18] sm:$0xff]  }
 0x729   : > { %3039 = vmatmul.mubr.msk.bf16.vlgmr.msra.gmra.mxu1 %vm1416_vm5, %v1858_v12  ;;  %v3160_v12 = vld [vmem:[%s3476_s27 + $0x8] sm:$0xff]  }
 0x72a   : > { %3049 = vmatpush3.bf16.msra.mxu1 %v3150_v11  ;;  %3050 = vmatprep.mubr.msk.bf16.mxu1 %vm3256_vm1, %v3255_v32  ;;  %v3159_v11 = vld [vmem:[%s3476_s27 + $0x10] sm:$0xff]  }
 0x72b   : > { %3062 = vmatprep.subr.bf16.mxu1 %v3255_v32 }
 0x731   : > { %3051 = vmatmul.mubr.msk.bf16.vlgmr.msra.gmra.mxu1 %vm1323_vm3, %v1534_v3 }
 0x732   : > { %3078 = vmatprep.mubr.msk.bf16.mxu1 %vm3256_vm1, %v3255_v32  ;;  %3063 = vmatpush3.bf16.msra.mxu1 %v3154_v7  ;;  %v2867_v7 = vld [vmem:[%s1025_s28] ss:$0 sm:$0xff]  ;;  %s3868_s28 = sld [smem:[#allocation26_spill]] (!%p2868_p5) }
 0x733   : > { %3064 = vmatprep.subr.bf16.mxu1 %v3255_v32 }
 0x736   : > { %3065 = vmatpush3.bf16.msra.mxu1 %v3155_v8 }
 0x737   : > { %3066 = vmatprep.subr.bf16.mxu1 %v3255_v32 }
 0x73a   : > { %3067 = vmatpush3.bf16.msra.mxu1 %v3156_v9 }
 0x73b   : > { %3068 = vmatprep.subr.bf16.mxu1 %v3255_v32 }
 0x73e   : > { %3069 = vmatpush3.bf16.msra.mxu1 %v3157_v10 }
 0x73f   : > { %3070 = vmatprep.subr.bf16.mxu1 %v3255_v32 }
 0x742   : > { %3071 = vmatpush3.bf16.msra.mxu1 %v3158_v37 }
 0x743   : > { %3072 = vmatprep.subr.bf16.mxu1 %v3255_v32 }
 0x746   : > { %3073 = vmatpush3.bf16.msra.mxu1 %v3159_v11 }
 0x747   : > { %3074 = vmatprep.subr.bf16.mxu1 %v3255_v32 }
 0x74a   : > { %3075 = vmatpush3.bf16.msra.mxu1 %v3160_v12 }
 0x74b   : > { %3076 = vmatprep.subr.bf16.mxu1 %v3255_v32 }
 0x74e   : > { %3077 = vmatpush3.bf16.msra.mxu1 %v3161_v13 }
 0x7e5   : > { %v1899_v14 = vpop.f32.mrf.mxu0 }
 0x7e7   : > { %v3034_v15 = vpop.f32.mrf.mxu0 }
 0x7e9   : > { %v1902_v16 = vpop.f32.mrf.mxu0  ;;  %v1945_v17 = vpop.f32.mrf.mxu1 }
 0x7ea   : > { %v1951_v18 = vpack.c.bf16 %v1945_v17, %v1899_v14  ;;  %v2853_v14 = vld [vmem:[%s1011_s1] ss:$0 sm:$0xff] }
 0x7eb   : > { %v3035_v19 = vpop.f32.mrf.mxu0  ;;  %v3040_v20 = vpop.f32.mrf.mxu1 }
 0x7ec   : > { %3045 = vmatmul.mubr.msk.bf16.vlgmr.msra.gmra.mxu0 %vm1323_vm3, %v1951_v18 }
 0x7ed   : > { %v1948_v63 = vpop.f32.mrf.mxu1  ;;  %3058 = vmatprep.mubr.msk.bf16.mxu0 %vm3256_vm1, %v3255_v32 }
 0x7ef   : > { %v3041_v1 = vpop.f32.mrf.mxu1 }
 0x7f1   : > { %v2048_v3 = vpop.f32.mrf.mxu1 }
 0x7f3   : > { %v3052_v21 = vpop.f32.mrf.mxu1 }
 0x7f5   : > { %v2051_v23 = vpop.f32.mrf.mxu1 }
 0x7f7   : > { %v3053_v25 = vpop.f32.mrf.mxu1 }
 0x8ac   : > { %v1998_v26 = vpop.f32.mrf.mxu0 }
 0x8ad   : > { %v2049_v28 = vadd.f32 %v2048_v3, %v1998_v26 }
 0x8ae   : > { %v3046_v29 = vpop.f32.mrf.mxu0 }
 0x8af   : > { %v2062_v30 = vadd.f32 %v2850_v27, %v2049_v28 }
 0x8b0   : > { %v2001_v31 = vpop.f32.mrf.mxu0 }
 0x8b1   : > { %v2052_v33 = vadd.f32 %v2051_v23, %v2001_v31  ;;  %v2064_v36 = vadd.f32 %v2062_v30, %v3515_v34 }
 0x8b2   : > { %v3047_v38 = vpop.f32.mrf.mxu0 }
 0x8b3   : > { %v2063_v39 = vadd.f32 %v2850_v27, %v2052_v33  ;;  %v2068_v40 = vsel %vm1132_vm2, %v2064_v36, 0.0 }
 0x8b4   : > { %2069 = vadd.xlane.f32.xlu0 %v2068_v40 }
 0x8b5   : > { %v2065_v41 = vadd.f32 %v2063_v39, %v3517_v35  ;;  %v3152_v35 = vld [vmem:[%s3466_s2 + $0x8] sm:$0xff]   ;;  %s3863_s2 = scalar_lea.vmem %s3801_s12, %s3411_s7 }
 0x8b6   : > { %3055 = vmatpush3.bf16.msra.mxu0 %v3152_v35  ;;  %v2851_v61 = vld [vmem:[%s3863_s2] ss:$0 sm:$0xff] }
 0x8b7   : > { %v2071_v42 = vsel %vm1132_vm2, %v2065_v41, 0.0  ;;  %3056 = vmatprep.subr.bf16.mxu0 %v3255_v32 }
 0x8b8   : > { %2072 = vadd.xlane.f32.xlu1 %v2071_v42  ;;  %v2857_v42 = vld [vmem:[%s1019_s4] ss:$0 sm:$0xff] }
 0x8ba   : > { %3057 = vmatpush3.bf16.msra.mxu0 %v3153_v52 }
 0x93d   : > { %v2070_v43 = vpop.xlane.xlu0 %2069 }
 0x93e   : > { %v2075_v44 = vmul.f32 0.03125, %v2070_v43 }
 0x940   : > { %v2077_v45 = vsub.f32 %v2064_v36, %v2075_v44 }
 0x941   : > { %v2073_v46 = vpop.xlane.xlu1 %2072 }
 0x942   : > { %v2076_v47 = vmul.f32 0.03125, %v2073_v46  ;;  %v2079_v48 = vmul.f32 %v2077_v45, %v2077_v45 }
 0x944   : > { %v2078_v49 = vsub.f32 %v2065_v41, %v2076_v47  ;;  %v2081_v34 = vsel %vm1132_vm2, %v2079_v48, 0.0 }
 0x945   : > { %2082 = vadd.xlane.f32.xlu0 %v2081_v34 }
 0x946   : > { %v2080_v50 = vmul.f32 %v2078_v49, %v2078_v49 }
 0x948   : > { %v2084_v51 = vsel %vm1132_vm2, %v2080_v50, 0.0 }
 0x949   : > { %2085 = vadd.xlane.f32.xlu1 %v2084_v51 }
 0x9ce   : > { %v2083_v53 = vpop.xlane.xlu0 %2082 }
 0x9cf   : > { %v2087_v54 = vmul.f32 0.03125, %v2083_v53 }
 0x9d1   : > { %v2089_v55 = vadd.f32 1e-12, %v2087_v54 }
 0x9d2   : > { %v2086_v56 = vpop.xlane.xlu1 %2085 }
 0x9d3   : > { %3178 = vrsqrt.f32 %v2089_v55  ;;  %v2088_v57 = vmul.f32 0.03125, %v2086_v56 }
 0x9d5   : > { %v2090_v58 = vadd.f32 1e-12, %v2088_v57 }
 0x9d7   : > { %3180 = vrsqrt.f32 %v2090_v58 }
 0x9e0   : > { %v3179_v59 = vpop.eup %3178 }
 0x9e1   : > { %v2093_v60 = vmul.f32 %v3179_v59, %v2077_v45 }
 0x9e3   : > { %v2101_v0 = vmul.f32 %v2851_v61, %v2093_v60 }
 0x9e4   : > { %v3181_v24 = vpop.eup %3180 }
 0x9e5   : > { %v2094_v62 = vmul.f32 %v3181_v24, %v2078_v49  ;;  %v2109_v4 = vadd.f32 %v2852_v2, %v2101_v0 }
 0x9e7   : > { %v2102_v22 = vmul.f32 %v2851_v61, %v2094_v62 }
 0x9e9   : > { %v3679_v5 = vadd.f32 %v2852_v2, %v2102_v22 }
 0x9eb   : > { %v2111_v6 = vpack.c.bf16 %v3679_v5, %v2109_v4 }
 0x9ed   : > { %3059 = vmatmul.mubr.msk.bf16.vlgmr.msra.gmra.mxu0 %vm1132_vm2, %v2111_v6 }
 0xaad   : > { %v2172_v15 = vpop.f32.mrf.mxu0 }
 0xaae   : > { %v2173_v16 = vadd.f32 %v2853_v14, %v2172_v15 }
 0xaaf   : > { %v3060_v17 = vpop.f32.mrf.mxu0 }
 0xab0   : > { %v2179_v18 = vmul.f32 %v2173_v16, %v2173_v16 }
 0xab1   : > { %v2175_v19 = vpop.f32.mrf.mxu0 }
 0xab2   : > { %v2181_v20 = vmul.f32 %v2179_v18, %v2173_v16  ;;  %v2176_v63 = vadd.f32 %v2853_v14, %v2175_v19 }
 0xab3   : > { %v3061_v1 = vpop.f32.mrf.mxu0 }
 0xab4   : > { %v2183_v3 = vmul.f32 0.044715, %v2181_v20  ;;  %v2180_v21 = vmul.f32 %v2176_v63, %v2176_v63 }
 0xab6   : > { %v2185_v23 = vadd.f32 %v2183_v3, %v2173_v16  ;;  %v2182_v25 = vmul.f32 %v2180_v21, %v2176_v63 }
 0xab8   : > { %v2187_v32 = vmul.f32 0.7978846, %v2185_v23  ;;  %v2184_v26 = vmul.f32 0.044715, %v2182_v25 }
 0xaba   : > { %3182 = vtanh.f32 %v2187_v32  ;;  %v2186_v27 = vadd.f32 %v2184_v26, %v2176_v63 }
 0xabc   : > { %v2188_v28 = vmul.f32 0.7978846, %v2186_v27 }
 0xabe   : > { %3184 = vtanh.f32 %v2188_v28 }
 0xac7   : > { %v3183_v29 = vpop.eup %3182 }
 0xac8   : > { %v2191_v30 = vadd.f32 1.0, %v3183_v29 }
 0xaca   : > { %v2193_v33 = vmul.f32 0.5, %v2191_v30 }
 0xacb   : > { %v3185_v31 = vpop.eup %3184 }
 0xacc   : > { %v2192_v36 = vadd.f32 1.0, %v3185_v31  ;;  %v2195_v39 = vmul.f32 %v2193_v33, %v2173_v16 }
 0xace   : > { %v2194_v38 = vmul.f32 0.5, %v2192_v36 }
 0xad0   : > { %v2196_v40 = vmul.f32 %v2194_v38, %v2176_v63 }
 0xad2   : > { %v2197_v41 = vpack.c.bf16 %v2196_v40, %v2195_v39 }
 0xad4   : > { %3079 = vmatmul.mubr.bf16.vlgmr.msra.gmra.mxu1 %v2197_v41 }
 0xb94   : > { %v2303_v43 = vpop.f32.mrf.mxu1 }
 0xb95   : > { %v2304_v44 = vadd.f32 %v2857_v42, %v2303_v43 }
 0xb96   : > { %v3080_v45 = vpop.f32.mrf.mxu1 }
 0xb97   : > { %v2310_v46 = vadd.f32 %v2304_v44, %v2109_v4 }
 0xb98   : > { %v2306_v47 = vpop.f32.mrf.mxu1 }
 0xb99   : > { %v2307_v48 = vadd.f32 %v2857_v42, %v2306_v47  ;;  %v2314_v49 = vsel %vm1132_vm2, %v2310_v46, 0.0 }
 0xb9a   : > { %2315 = vadd.xlane.f32.xlu0 %v2314_v49  ;;  %v3081_v34 = vpop.f32.mrf.mxu1 }
 0xb9b   : > { %v2311_v50 = vadd.f32 %v2307_v48, %v3679_v5  ;;  %v2866_v5 = vld [vmem:[%s1022_s8] ss:$0 sm:$0xff] }
 0xb9d   : > { %v2317_v51 = vsel %vm1132_vm2, %v2311_v50, 0.0 }
 0xb9e   : > { %2318 = vadd.xlane.f32.xlu1 %v2317_v51 }
 0xc23   : > { %v2316_v35 = vpop.xlane.xlu0 %2315 }
 0xc24   : > { %v2320_v52 = vmul.f32 0.03125, %v2316_v35 }
 0xc26   : > { %v2322_v53 = vsub.f32 %v2310_v46, %v2320_v52 }
 0xc27   : > { %v2319_v54 = vpop.xlane.xlu1 %2318 }
 0xc28   : > { %v2321_v55 = vmul.f32 0.03125, %v2319_v54  ;;  %v2324_v56 = vmul.f32 %v2322_v53, %v2322_v53 }
 0xc2a   : > { %v2323_v57 = vsub.f32 %v2311_v50, %v2321_v55  ;;  %v2326_v58 = vsel %vm1132_vm2, %v2324_v56, 0.0 }
 0xc2b   : > { %2327 = vadd.xlane.f32.xlu0 %v2326_v58 }
 0xc2c   : > { %v2325_v59 = vmul.f32 %v2323_v57, %v2323_v57 }
 0xc2e   : > { %v2329_v60 = vsel %vm1132_vm2, %v2325_v59, 0.0 }
 0xc2f   : > { %2330 = vadd.xlane.f32.xlu1 %v2329_v60 }
 0xcb4   : > { %v2328_v61 = vpop.xlane.xlu0 %2327 }
 0xcb5   : > { %v2332_v24 = vmul.f32 0.03125, %v2328_v61 }
 0xcb7   : > { %v2334_v62 = vadd.f32 1e-12, %v2332_v24 }
 0xcb8   : > { %v2331_v0 = vpop.xlane.xlu1 %2330 }
 0xcb9   : > { %3186 = vrsqrt.f32 %v2334_v62  ;;  %v2333_v2 = vmul.f32 0.03125, %v2331_v0 }
 0xcbb   : > { %v2335_v22 = vadd.f32 1e-12, %v2333_v2 }
 0xcbd   : > { %3188 = vrsqrt.f32 %v2335_v22 }
 0xcc6   : > { %v3187_v4 = vpop.eup %3186 }
 0xcc7   : > { %v2338_v6 = vmul.f32 %v3187_v4, %v2322_v53 }
 0xcc9   : > { %v2346_v8 = vmul.f32 %v2866_v5, %v2338_v6 }
 0xcca   : > { %v3189_v9 = vpop.eup %3188 }
 0xccb   : > { %v2354_v10 = vadd.f32 %v2867_v7, %v2346_v8  ;;  %v2339_v37 = vmul.f32 %v3189_v9, %v2323_v57 }
 0xccd   : > { %2356 = vst.msk [vmem:[#allocation2] sm:$0xff] %vm1132_vm2, %v2354_v10  ;;  %v2347_v11 = vmul.f32 %v2866_v5, %v2339_v37  ;;  %2361 = sbr.rel (%p2868_p5) target bundleno = 3684 (0xe64), region = 128 }
 0xccf   : > { %v2355_v12 = vadd.f32 %v2867_v7, %v2347_v11 }
 0xcd1   : > { %2357 = vst.msk [vmem:[#allocation2 + $0x8] sm:$0xff] %vm1132_vm2, %v2355_v12 }
 0xcd2   : > { %v2374_v13 = vld [vmem:[%s3865_s21 + $0x18] sm:$0xff]  ;;  %v3258_v14 = vmov 0.0   ;;  %v2373_v15 = vld [vmem:[%s3865_s21 + $0x10] sm:$0xff]  ;;  %vm3259_vm6 = vmmov 0   ;;  %v2869_v16 = vld [vmem:[%s3866_s10] ss:$0 sm:$0xff] }
 0xcd3   : > { %3082 = vmatprep.subr.mxu0 %v3258_v14  ;;  %3090 = vmatprep.mubr.msk.f32.mxu0 %vm3259_vm6, %v3258_v14  ;;  %v2463_v17 = vld [vmem:[%s3867_s5 + $0x18] sm:$0xff]  ;;  %v2369_v18 = vmul.f32 %v2869_v16, %v2354_v10  ;;  %v2370_v19 = vmul.f32 %v2869_v16, %v2355_v12  ;;  %v2372_v20 = vld [vmem:[%s3865_s21 + $0x8] sm:$0xff]  ;;  %vm2385_vm7 = vcmask 1041409   ;;  %v2371_v1 = vld [vmem:[%s3865_s21] sm:$0xff]  ;;  %s3869_s10 = sld [smem:[#allocation28_spill]] }
 0xcd4   : > { %3083 = vmatpush3.msra.mxu0 %v2374_v13  ;;  %3093 = vmatprep.subr.mxu1 %v3258_v14  ;;  %v2462_v21 = vld [vmem:[%s3867_s5 + $0x10] sm:$0xff]  ;;  %v2461_v23 = vld [vmem:[%s3867_s5 + $0x8] sm:$0xff]  ;;  %v2460_v25 = vld [vmem:[%s3867_s5] sm:$0xff] }
 0xcd5   : > { %3084 = vmatprep.subr.mxu0 %v3258_v14  ;;  %3094 = vmatpush3.msra.mxu1 %v2463_v17  ;;  %v2384_v63 = vrot.slane %v2370_v19, 7  ;;  %v2870_v32 = vld [vmem:[%s3868_s28] ss:$0 sm:$0xff] }
 0xcd6   : > { %3085 = vmatpush3.msra.mxu0 %v2373_v15  ;;  %3095 = vmatprep.subr.mxu1 %v3258_v14 }
 0xcd7   : > { %3086 = vmatprep.subr.mxu0 %v3258_v14  ;;  %3101 = vmatprep.mubr.msk.f32.mxu1 %vm3259_vm6, %v3258_v14  ;;  %v2386_v3 = vsel %vm2385_vm7, %v2384_v63, %v2369_v18 }
 0xcd8   : > { %3087 = vmatpush3.msra.mxu0 %v2372_v20  ;;  %3096 = vmatpush3.msra.mxu1 %v2462_v21 }
 0xcd9   : > { %3088 = vmatprep.subr.mxu0 %v3258_v14  ;;  %3097 = vmatprep.subr.mxu1 %v3258_v14  ;;  %v2872_v30 = vld [vmem:[%s3869_s10] ss:$0 sm:$0xff] }
 0xcda   : > { %3089 = vmatpush3.msra.mxu0 %v2371_v1  ;;  %3098 = vmatpush3.msra.mxu1 %v2461_v23 }
 0xcdb   : > { %3091 = vmatmul.mubr.msk.f32.vlgmr.msra.gmra.mxu0 %vm1132_vm2, %v2386_v3  ;;  %3099 = vmatprep.subr.mxu1 %v3258_v14 }
 0xcdc   : > { %3100 = vmatpush3.msra.mxu1 %v2460_v25 }
 0xd9b   : > { %v2455_v26 = vpop.f32.mrf.mxu0 }
 0xd9c   : > { %v2456_v27 = vadd.f32 %v2870_v32, %v2455_v26 }
 0xd9d   : > { %v3092_v28 = vpop.f32.mrf.mxu0 }
 0xd9e   : > { %v2459_v29 = vmax.f32 %v2456_v27, 0.0 }
 0xda0   : > { %3102 = vmatmul.mubr.msk.f32.vlgmr.msra.gmra.mxu1 %vm1132_vm2, %v2459_v29 }
 0xe60   : > { %v2540_v31 = vpop.f32.mrf.mxu1 }
 0xe61   : > { %v2541_v33 = vadd.f32 %v2872_v30, %v2540_v31 }
 0xe62   : > { %v3103_v36 = vpop.f32.mrf.mxu1 }
 0xe63   : > { %2544 = vst [vmem:[#allocation4] sm:$0x3] %v2541_v33 }
 0xe64 PF: > { %p3112_p6 = scmp.eq.s32.totalorder %s3405_s3, 1  ;;  %s3260_s2 = smov [#allocation2]  }
 0xe65   : > { %s2551_s30 = sshll.u32 %s3260_s2, 4  ;;  %s2552_s30 = int_to_ptr.vmem [resolvable:$true] %s2551_s30 }
 0xe66   : > { %s3190_s6 = scalar_lea.vmem %s2552_s30, 256  ;;  %p3197_p10 = scmp.lt.s32.totalorder %s2552_s30, %s2552_s30 }
 0xe67   : > { %p3191_p7 = scmp.ne.s32.totalorder %s2552_s30, %s3190_s6  ;;  %p3198_p11 = scmp.lt.s32.totalorder %s3190_s6, %s3190_s6 }
 0xe69   : > { %p3192_p8 = pnand %p3191_p7, %p3112_p6  ;;  %p3199_p12 = por %p3198_p11, %p3197_p10 }
 0xe6b   : > { %p3193_p9 = pneg %p3192_p8 }
 0xe6d   : > { %p3200_p13 = pnand %p3199_p12, %p3193_p9 }
 0xe6f   : > { %3203 = shalt.err (!%p3200_p13)
}
 0xe70   : > { %s3261_s26 = smov 128   ;;  %s3262_s24 = smov 8  }
 0xe71   : > { %s3870_s4 = sld [smem:[#allocation29_spill]]  ;;  %s3263_s0 = smov [#allocation4]  }
 0xe72   : > { %s2565_s23 = sshll.u32 %s3263_s0, 4  ;;  %s2566_s23 = int_to_ptr.vmem [resolvable:$true] %s2565_s23 }
 0xe73   : > { %s3214_s25 = scalar_lea.vmem %s2566_s23, 32  ;;  %p3221_p3 = scmp.lt.s32.totalorder %s2566_s23, %s2566_s23 }
 0xe74   : > { %p3215_p0 = scmp.ne.s32.totalorder %s2566_s23, %s3214_s25  ;;  %p3222_p4 = scmp.lt.s32.totalorder %s3214_s25, %s3214_s25 }
 0xe76   : > { %p3216_p1 = pnand %p3215_p0, %p3112_p6  ;;  %p3223_p5 = por %p3222_p4, %p3221_p3 }
 0xe77   : > { %3105 = dma.vmem_to_hbm [thread:$0]  (%p3112_p6), %s2552_s30, 256, %s3870_s4, [#allocation3], %s3261_s26, %s3261_s26, %s3262_s24  }
 0xe78   : > { %p3217_p2 = pneg %p3216_p1 }
 0xe7a   : > { %p3224_p7 = pnand %p3223_p5, %p3217_p2 }
 0xe7c   : > { %3227 = shalt.err (!%p3224_p7)
}
 0xe7d   : > { %s3871_s7 = sld [smem:[#allocation30_spill]] }
 0xe83   : > { %3107 = dma.vmem_to_hbm [thread:$0]  (%p3112_p6), %s2566_s23, 32, %s3871_s7, [#allocation5]  }
 0xe84   : > { %3243 = dma.done.wait (%p3112_p6), [#allocation3], 256  }
 0xe85   : > { %3245 = vsyncadd (%p3112_p6), [#allocation3], 4294967040 }
 0xe86   : > { %3247 = dma.done.wait (%p3112_p6), [#allocation5], 32  }
 0xe87   : > { %3249 = vsyncadd (%p3112_p6), [#allocation5], 4294967264 }
 0xe88 PF: > { %s3872_s28 = sld [smem:[#allocation8_spill]] }
 0xe8e   : > { %s39_s27 = sadd.s32 1, %s3872_s28  }
 0xe8f   : > { %p36_p8 = scmp.ge.s32.totalorder %s39_s27, 4  }
 0xe91   :  { %38 = sbr.rel (!%p36_p8) target bundleno = 21 (0x15), region = 215 }
 0xe96   :  { %2582 = vsyncpa [#allocation3], 1 }
 0xe97   :  { %2584 = vsyncpa [#allocation3 + $0x1], 1 }
 0xe98   :  { %2585 = vsyncpa [#allocation5], 1 }

</bundles_post_ra>
